<compile_context>
chip_gen: v7x
topology: tpu7x:2x2x1
jax: 0.10.0
libtpu: 0.0.40
codegen_flags: <defaults>
</compile_context>

<pallas_src>
import functools

import jax
import jax.numpy as jnp
import numpy as np
from jax import lax
from jax.experimental import pallas as pl
from jax.experimental.pallas import tpu as pltpu


def _round_up(x, m):
    return (x + m - 1) // m * m


def _query_vmem_capacity():
    """Physical VMEM per core; conservative 64 MiB (v7x-sized) fallback."""
    try:
        info = pltpu.get_tpu_info()
        cap = int(getattr(info, "vmem_capacity_bytes", 0) or 0)
        if cap > 0:
            return cap
    except Exception:
        pass
    return 64 * 1024 * 1024


_VMEM_CAP = _query_vmem_capacity()


# ----------------------------------------------------------------------------
# Pallas LSTM recurrence kernel (input projection fused).
# ----------------------------------------------------------------------------
def _lstm_kernel(x_ref, wih_ref, whh_ref, h0_ref, c0_ref,
                 out_ref, hn_ref, cn_ref, h_scr, c_scr,
                 *, chunk, seq_len, needs_mask, unroll):
    """One grid step = one (batch tile, time chunk).

    x_ref  : (chunk, BT, Dp)  bf16  raw inputs (+ ones-column feeding the bias row)
    wih_ref: (Dp, 4*Hp)       bf16  resident W_ih^T (bias folded, i/f/o pre-scaled 0.5)
    whh_ref: (Hp, 4*Hp)       bf16  resident W_hh^T (i/f/o pre-scaled 0.5)
    h0/c0  : (1, BT, Hp)      f32
    out    : (chunk, BT, Hp)
    hn/cn  : (1, BT, Hp)            written only on the last time chunk
    h_scr  : (BT, Hp) bf16 carry (only ever consumed by the bf16 MXU matmul)
    c_scr  : (BT, Hp) f32  carry
    """
    t_blk = pl.program_id(1)
    Hp = c_scr.shape[-1]

    @pl.when(t_blk == 0)
    def _():
        h_scr[...] = h0_ref[0].astype(h_scr.dtype)
        c_scr[...] = c0_ref[0].astype(c_scr.dtype)

    # Loop-invariant weight operands.
    w_ih = wih_ref[...]
    w_hh = whh_ref[...]

    def step(tt, carry):
        del carry
        c = c_scr[...]
        x_t = x_ref[tt]                                    # (BT, Dp) bf16
        # Input projection is independent of the carry -> MXU filler that the
        # unrolled schedule overlaps with the serial h @ W_hh^T matmul.
        gates = (jnp.dot(x_t, w_ih, preferred_element_type=jnp.float32)
                 + jnp.dot(h_scr[...], w_hh, preferred_element_type=jnp.float32))

        # Lane-aligned gate slices (Hp is a multiple of 128), PyTorch order i,f,g,o.
        # i/f/o columns were pre-scaled by 0.5 at pack time:
        # sigmoid(z) = 0.5 * tanh(0.5 * z) + 0.5  -> one EUP op per gate, no pre-mul.
        i_g = 0.5 * jnp.tanh(gates[:, 0 * Hp:1 * Hp]) + 0.5
        f_g = 0.5 * jnp.tanh(gates[:, 1 * Hp:2 * Hp]) + 0.5
        g_g = jnp.tanh(gates[:, 2 * Hp:3 * Hp])
        o_g = 0.5 * jnp.tanh(gates[:, 3 * Hp:4 * Hp]) + 0.5

        c_new = f_g * c + i_g * g_g
        h_new = o_g * jnp.tanh(c_new)

        if needs_mask:  # only traced when T was padded up to a chunk multiple
            valid = (t_blk * chunk + tt) < seq_len
            c_new = jnp.where(valid, c_new, c)
            h_new = jnp.where(valid, h_new, h_scr[...].astype(jnp.float32))

        h_scr[...] = h_new.astype(h_scr.dtype)             # bf16: next matmul operand
        c_scr[...] = c_new
        out_ref[tt] = h_new.astype(out_ref.dtype)
        return 0

    lax.fori_loop(0, chunk, step, 0, unroll=unroll)

    @pl.when(t_blk == pl.num_programs(1) - 1)
    def _():
        hn_ref[0] = h_scr[...].astype(hn_ref.dtype)
        cn_ref[0] = c_scr[...].astype(cn_ref.dtype)


# ----------------------------------------------------------------------------
# Weight packing (done once, outside the per-call hot path).
# ----------------------------------------------------------------------------
def pack_lstm_params(w_ih, w_hh, b_ih, b_hh):
    """Pack PyTorch-layout LSTM params for the kernel.

    Returns:
      wih_t: (Dp, 4*Hp) bf16 — transposed input weights, gate columns zero-padded to Hp,
             bias folded in as row D (the wrapper appends a ones-column to x),
             i/f/o gate columns pre-scaled by 0.5.
      whh_t: (Hp, 4*Hp) bf16 — transposed recurrent weights, same packing.
    """
    H = w_hh.shape[1]
    D = w_ih.shape[1]
    Hp = _round_up(H, 128)
    Dp = _round_up(D + 1, 128)                 # +1 input row for the folded bias
    gate_scale = jnp.array([0.5, 0.5, 1.0, 0.5], jnp.float32).reshape(1, 4, 1)

    wih = jnp.concatenate([w_ih, (b_ih + b_hh)[:, None]], axis=1)        # (4H, D+1)
    wih_t = jnp.transpose(wih.reshape(4, H, D + 1), (2, 0, 1)) * gate_scale  # (D+1,4,H)
    wih_t = jnp.pad(wih_t, ((0, Dp - (D + 1)), (0, 0), (0, Hp - H)))
    wih_t = wih_t.reshape(Dp, 4 * Hp).astype(jnp.bfloat16)

    whh_t = jnp.transpose(w_hh.reshape(4, H, H), (2, 0, 1)) * gate_scale     # (H,4,H)
    whh_t = jnp.pad(whh_t, ((0, Hp - H), (0, 0), (0, Hp - H)))
    whh_t = whh_t.reshape(Hp, 4 * Hp).astype(jnp.bfloat16)
    return wih_t, whh_t


# ----------------------------------------------------------------------------
# Forward wrapper.
# ----------------------------------------------------------------------------
def _lstm_forward_impl(x, h0, c0, wih_t, whh_t):
    """x: (T, B, D) ; h0/c0: (1, B, H) ; packed weights from pack_lstm_params."""
    T, B, D = x.shape
    H = h0.shape[-1]
    Dp = wih_t.shape[0]
    Hp = whh_t.shape[0]
    out_dtype = x.dtype
    out_bytes = jnp.dtype(out_dtype).itemsize

    # ---- batch tiling: sublane multiples; >= 2 tiles when B permits so both v7x
    #      TensorCores get work on the "parallel" axis ------------------------------
    BT = min(_round_up(B, 8), 128)
    if B >= 16:
        BT = min(BT, _round_up(-(-B // 2), 8))
    Bp = _round_up(B, BT)
    nb = Bp // BT

    # ---- time-chunk size derived from the per-generation VMEM capacity -----------
    fixed = (2 * (Dp + Hp) * (4 * Hp) * 2        # W_ih^T + W_hh^T (bf16, double-buffered)
             + 8 * BT * Hp * 4                   # h0/c0/hn/cn blocks (double-buffered)
             + BT * Hp * (2 + 4))                # h (bf16) + c (f32) carries
    per_tt = BT * (2 * Dp * 2                    # x stream (bf16, double-buffered)
                   + 2 * Hp * out_bytes)         # out stream (double-buffered)
    budget = int(0.65 * _VMEM_CAP)
    TT = (budget - fixed) // per_tt if budget > fixed else 1
    TT = int(max(1, min(TT, T, 256)))
    Tp = _round_up(T, TT)
    nt = Tp // TT

    est = fixed + TT * per_tt
    vmem_limit = int(min(max(2 * est, 32 * 1024 * 1024), int(0.92 * _VMEM_CAP)))
    vmem_limit = int(max(vmem_limit, min(est + (8 << 20), _VMEM_CAP)))

    # ---- pad inputs; x gets a ones-column that feeds the folded-bias weight row ---
    xb = jnp.concatenate(
        [x.astype(jnp.bfloat16), jnp.ones((T, B, 1), jnp.bfloat16)], axis=-1)
    xb = jnp.pad(xb, ((0, Tp - T), (0, Bp - B), (0, Dp - (D + 1))))
    h0p = jnp.pad(h0.astype(jnp.float32), ((0, 0), (0, Bp - B), (0, Hp - H)))
    c0p = jnp.pad(c0.astype(jnp.float32), ((0, 0), (0, Bp - B), (0, Hp - H)))

    kernel = functools.partial(
        _lstm_kernel, chunk=TT, seq_len=T, needs_mask=(Tp != T),
        unroll=int(min(8, TT)))

    out_shapes = (
        jax.ShapeDtypeStruct((Tp, Bp, Hp), out_dtype),
        jax.ShapeDtypeStruct((1, Bp, Hp), out_dtype),
        jax.ShapeDtypeStruct((1, Bp, Hp), out_dtype),
    )

    grid_spec = pltpu.PrefetchScalarGridSpec(
        num_scalar_prefetch=0,
        grid=(nb, nt),
        in_specs=[
            pl.BlockSpec((TT, BT, Dp), lambda b, t: (t, b, 0)),   # x chunk (bf16)
            pl.BlockSpec((Dp, 4 * Hp), lambda b, t: (0, 0)),      # W_ih^T (resident)
            pl.BlockSpec((Hp, 4 * Hp), lambda b, t: (0, 0)),      # W_hh^T (resident)
            pl.BlockSpec((1, BT, Hp), lambda b, t: (0, b, 0)),    # h0 tile
            pl.BlockSpec((1, BT, Hp), lambda b, t: (0, b, 0)),    # c0 tile
        ],
        out_specs=[
            pl.BlockSpec((TT, BT, Hp), lambda b, t: (t, b, 0)),   # out chunk
            pl.BlockSpec((1, BT, Hp), lambda b, t: (0, b, 0)),    # hn tile
            pl.BlockSpec((1, BT, Hp), lambda b, t: (0, b, 0)),    # cn tile
        ],
        scratch_shapes=[
            pltpu.VMEM((BT, Hp), jnp.bfloat16),                   # h carry (MXU operand)
            pltpu.VMEM((BT, Hp), jnp.float32),                    # c carry
        ],
    )

    out_p, hn_p, cn_p = pl.pallas_call(
        kernel,
        out_shape=out_shapes,
        grid_spec=grid_spec,
        compiler_params=pltpu.CompilerParams(
            dimension_semantics=("parallel", "arbitrary"),
            vmem_limit_bytes=vmem_limit),
    )(xb, wih_t, whh_t, h0p, c0p)

    return out_p[:T, :B, :H], hn_p[:, :B, :H], cn_p[:, :B, :H]


_lstm_forward = jax.jit(_lstm_forward_impl)


@jax.jit
def lstm_pallas(x, h0, c0, w_ih, w_hh, b_ih, b_hh):
    """Single-layer LSTM forward (PyTorch nn.LSTM semantics), packing included."""
    wih_t, whh_t = pack_lstm_params(w_ih, w_hh, b_ih, b_hh)
    return _lstm_forward_impl(x, h0, c0, wih_t, whh_t)


# ----------------------------------------------------------------------------
# Pure-JAX reference (PyTorch nn.LSTM semantics) for the correctness check.
# ----------------------------------------------------------------------------
def lstm_ref(x, h0, c0, w_ih, w_hh, b_ih, b_hh):
    def step(carry, xt):
        h, c = carry
        gates = xt @ w_ih.T + b_ih + h @ w_hh.T + b_hh
        i, f, g, o = jnp.split(gates, 4, axis=-1)
        i = jax.nn.sigmoid(i)
        f = jax.nn.sigmoid(f)
        g = jnp.tanh(g)
        o = jax.nn.sigmoid(o)
        c = f * c + i * g
        h = o * jnp.tanh(c)
        return (h, c), h

    (hT, cT), ys = lax.scan(step, (h0[0], c0[0]), x)
    return ys, hT[None], cT[None]


# ----------------------------------------------------------------------------
# Memory module (mirrors rsl_rl Memory forward semantics).
# ----------------------------------------------------------------------------
class Memory:
    def __init__(self, input_size, type='lstm', num_layers=1, hidden_size=256,
                 key=jax.random.PRNGKey(0)):
        assert type.lower() == 'lstm', "only LSTM implemented"
        assert num_layers == 1, "only num_layers=1 implemented"
        # TODO(synk): GRU variant and num_layers > 1 not implemented.
        self.input_size = input_size
        self.hidden_size = hidden_size
        k = 1.0 / np.sqrt(hidden_size)  # PyTorch default uniform init bound
        k1, k2, k3, k4 = jax.random.split(key, 4)
        H, D = hidden_size, input_size
        self.w_ih = jax.random.uniform(k1, (4 * H, D), jnp.float32, -k, k)
        self.w_hh = jax.random.uniform(k2, (4 * H, H), jnp.float32, -k, k)
        self.b_ih = jax.random.uniform(k3, (4 * H,), jnp.float32, -k, k)
        self.b_hh = jax.random.uniform(k4, (4 * H,), jnp.float32, -k, k)
        # Pack / pad / transpose / scale the weights ONCE (not per forward call).
        self._packed = tuple(jax.block_until_ready(
            pack_lstm_params(self.w_ih, self.w_hh, self.b_ih, self.b_hh)))
        self.hidden_states = None

    def forward(self, input, masks=None, hidden_states=None):
        batch_mode = masks is not None
        if batch_mode:
            if hidden_states is None:
                raise ValueError(
                    'Hidden states not passed to memory module during policy update')
            h0, c0 = hidden_states
            out, _, _ = _lstm_forward(input, h0, c0, *self._packed)
            # TODO(synk): unpad_trajectories(out, masks) is external rsl_rl glue
            # (variable-length gather); returning the padded RNN output here.
            return out
        else:
            B = input.shape[0]
            if self.hidden_states is None:
                h0 = jnp.zeros((1, B, self.hidden_size), jnp.float32)
                c0 = jnp.zeros((1, B, self.hidden_size), jnp.float32)
            else:
                h0, c0 = self.hidden_states
            out, hn, cn = _lstm_forward(input[None], h0, c0, *self._packed)
            self.hidden_states = (hn, cn)
            return out

    def reset(self, dones=None):
        if self.hidden_states is None:
            return
        if dones is None:
            self.hidden_states = tuple(jnp.zeros_like(s)
                                       for s in self.hidden_states)
        else:
            dones = jnp.asarray(dones)
            if dones.dtype == jnp.bool_:
                mask = dones.reshape(1, -1, 1)
                self.hidden_states = tuple(
                    jnp.where(mask, jnp.zeros_like(s), s)
                    for s in self.hidden_states)
            else:
                self.hidden_states = tuple(
                    s.at[:, dones, :].set(0.0) for s in self.hidden_states)


if __name__ == "__main__":
    key = jax.random.PRNGKey(0)
    T, B, D, H = 8, 4, 16, 32

    mem = Memory(input_size=D, type='lstm', num_layers=1, hidden_size=H,
                 key=jax.random.PRNGKey(0))

    kx, kh, kc = jax.random.split(key, 3)
    x = jax.random.normal(kx, (T, B, D), jnp.float32)
    h0 = jax.random.normal(kh, (1, B, H), jnp.float32)
    c0 = jax.random.normal(kc, (1, B, H), jnp.float32)
    masks = jnp.ones((T, B), jnp.bool_)

    # Full-sequence run through the Pallas kernel (checks out, hn, cn).
    out, hn, cn = lstm_pallas(x, h0, c0, mem.w_ih, mem.w_hh, mem.b_ih, mem.b_hh)
    out, hn, cn = jax.block_until_ready((out, hn, cn))

    # Batch (policy-update) mode via the Memory module (uses cached packed weights).
    mod_out = mem.forward(x, masks=masks, hidden_states=(h0, c0))
    mod_out = jax.block_until_ready(mod_out)

    # Inference mode: single step, hidden state carried inside the module.
    step_out = mem.forward(x[0])
    step_out = jax.block_until_ready(step_out)

    # Correctness check vs. pure-JAX f32 reference (bf16 MXU operands in the kernel
    # -> slightly relaxed tolerance).
    ref_out, ref_hn, ref_cn = lstm_ref(x, h0, c0, mem.w_ih, mem.w_hh,
                                       mem.b_ih, mem.b_hh)
    np.testing.assert_allclose(np.asarray(out), np.asarray(ref_out),
                               atol=5e-2, rtol=5e-2)
    np.testing.assert_allclose(np.asarray(hn), np.asarray(ref_hn),
                               atol=5e-2, rtol=5e-2)
    np.testing.assert_allclose(np.asarray(cn), np.asarray(ref_cn),
                               atol=5e-2, rtol=5e-2)
    np.testing.assert_allclose(np.asarray(mod_out), np.asarray(ref_out),
                               atol=5e-2, rtol=5e-2)

    assert out.shape == (T, B, H)
    assert hn.shape == (1, B, H) and cn.shape == (1, B, H)
    assert step_out.shape == (1, B, H)
    print("KERNEL_OK")
</pallas_src>

<mosaic_0001>
module attributes {stable_mosaic.version = 11 : i64} {
  func.func @_lstm_kernel(%arg0: i32, %arg1: i32, %arg2: memref<8x8x128xbf16, #tpu.memory_space<vmem>>, %arg3: memref<128x512xbf16, #tpu.memory_space<vmem>>, %arg4: memref<128x512xbf16, #tpu.memory_space<vmem>>, %arg5: memref<1x8x128xf32, #tpu.memory_space<vmem>>, %arg6: memref<1x8x128xf32, #tpu.memory_space<vmem>>, %arg7: memref<8x8x128xf32, #tpu.memory_space<vmem>>, %arg8: memref<1x8x128xf32, #tpu.memory_space<vmem>>, %arg9: memref<1x8x128xf32, #tpu.memory_space<vmem>>, %arg10: memref<8x128xbf16, #tpu.memory_space<vmem>>, %arg11: memref<8x128xf32, #tpu.memory_space<vmem>>) attributes {dimension_semantics = [#tpu.dimension_semantics<parallel>, #tpu.dimension_semantics<arbitrary>], iteration_bounds = array<i64: 1, 1>, scalar_prefetch = 0 : i64, scratch_operands = 2 : i64, tpu.core_type = #tpu.core_type<tc>, window_params = [{transform_indices = @transform_0, window_bounds = array<i64: 8, 8, 128>}, {pipeline_mode = #tpu.pipeline_mode<synchronous>, transform_indices = @transform_1, window_bounds = array<i64: 128, 512>}, {pipeline_mode = #tpu.pipeline_mode<synchronous>, transform_indices = @transform_2, window_bounds = array<i64: 128, 512>}, {transform_indices = @transform_3, window_bounds = array<i64: 1, 8, 128>}, {transform_indices = @transform_4, window_bounds = array<i64: 1, 8, 128>}, {transform_indices = @transform_5, window_bounds = array<i64: 8, 8, 128>}, {transform_indices = @transform_6, window_bounds = array<i64: 1, 8, 128>}, {transform_indices = @transform_7, window_bounds = array<i64: 1, 8, 128>}]} {
    %c0_i32 = arith.constant 0 : i32
    %0 = arith.cmpi eq, %arg1, %c0_i32 : i32
    %1 = arith.extui %0 : i1 to i32
    %c0_i32_0 = arith.constant 0 : i32
    %2 = arith.cmpi ne, %1, %c0_i32_0 : i32
    scf.if %2 {
      %c0_166 = arith.constant 0 : index
      %c0_167 = arith.constant 0 : index
      %c0_168 = arith.constant 0 : index
      %328 = vector.load %arg5[%c0_166, %c0_167, %c0_168] : memref<1x8x128xf32, #tpu.memory_space<vmem>>, vector<1x8x128xf32>
      %329 = vector.shape_cast %328 : vector<1x8x128xf32> to vector<8x128xf32>
      %330 = arith.truncf %329 : vector<8x128xf32> to vector<8x128xbf16>
      %c0_169 = arith.constant 0 : index
      %c0_170 = arith.constant 0 : index
      %331 = vector.load %arg10[%c0_169, %c0_170] : memref<8x128xbf16, #tpu.memory_space<vmem>>, vector<8x128xbf16>
      tpu.vector_store %arg10[%c0_169, %c0_170], %330 {strides = array<i32>} : memref<8x128xbf16, #tpu.memory_space<vmem>>, vector<8x128xbf16>,
      %c0_171 = arith.constant 0 : index
      %c0_172 = arith.constant 0 : index
      %c0_173 = arith.constant 0 : index
      %332 = vector.load %arg6[%c0_171, %c0_172, %c0_173] : memref<1x8x128xf32, #tpu.memory_space<vmem>>, vector<1x8x128xf32>
      %333 = vector.shape_cast %332 : vector<1x8x128xf32> to vector<8x128xf32>
      %c0_174 = arith.constant 0 : index
      %c0_175 = arith.constant 0 : index
      %334 = vector.load %arg11[%c0_174, %c0_175] : memref<8x128xf32, #tpu.memory_space<vmem>>, vector<8x128xf32>
      tpu.vector_store %arg11[%c0_174, %c0_175], %333 {strides = array<i32>} : memref<8x128xf32, #tpu.memory_space<vmem>>, vector<8x128xf32>,
    } else {
    }
    %c0 = arith.constant 0 : index
    %c0_1 = arith.constant 0 : index
    %3 = vector.load %arg3[%c0, %c0_1] : memref<128x512xbf16, #tpu.memory_space<vmem>>, vector<128x512xbf16>
    %c0_2 = arith.constant 0 : index
    %c0_3 = arith.constant 0 : index
    %4 = vector.load %arg4[%c0_2, %c0_3] : memref<128x512xbf16, #tpu.memory_space<vmem>>, vector<128x512xbf16>
    %c0_i32_4 = arith.constant 0 : i32
    %c0_5 = arith.constant 0 : index
    %c0_6 = arith.constant 0 : index
    %5 = vector.load %arg11[%c0_5, %c0_6] : memref<8x128xf32, #tpu.memory_space<vmem>>, vector<8x128xf32>
    %6 = arith.index_cast %c0_i32_4 : i32 to index
    %c0_7 = arith.constant 0 : index
    %c0_8 = arith.constant 0 : index
    %7 = vector.load %arg2[%6, %c0_7, %c0_8] : memref<8x8x128xbf16, #tpu.memory_space<vmem>>, vector<1x8x128xbf16>
    %8 = vector.shape_cast %7 : vector<1x8x128xbf16> to vector<8x128xbf16>
    %cst = arith.constant dense<0.000000e+00> : vector<8x512xf32>
    %9 = tpu.matmul %8, %3, %cst {dimension_numbers = #tpu.dot_dimension_numbers<[1], [0], [0], [1], [0, 0, 1, 1], [], []>} : vector<8x128xbf16>, vector<128x512xbf16>, vector<8x512xf32> -> vector<8x512xf32>
    %c0_9 = arith.constant 0 : index
    %c0_10 = arith.constant 0 : index
    %10 = vector.load %arg10[%c0_9, %c0_10] : memref<8x128xbf16, #tpu.memory_space<vmem>>, vector<8x128xbf16>
    %cst_11 = arith.constant dense<0.000000e+00> : vector<8x512xf32>
    %11 = tpu.matmul %10, %4, %cst_11 {dimension_numbers = #tpu.dot_dimension_numbers<[1], [0], [0], [1], [0, 0, 1, 1], [], []>} : vector<8x128xbf16>, vector<128x512xbf16>, vector<8x512xf32> -> vector<8x512xf32>
    %12 = arith.addf %9, %11 : vector<8x512xf32>
    %13 = vector.extract_strided_slice %12 {offsets = [0, 0], sizes = [8, 128], strides = [1, 1]} : vector<8x512xf32> to vector<8x128xf32>
    %14 = math.tanh %13 : vector<8x128xf32>
    %cst_12 = arith.constant 5.000000e-01 : f32
    %15 = vector.broadcast %cst_12 : f32 to vector<8x128xf32>
    %16 = arith.mulf %15, %14 : vector<8x128xf32>
    %cst_13 = arith.constant 5.000000e-01 : f32
    %17 = vector.broadcast %cst_13 : f32 to vector<8x128xf32>
    %18 = arith.addf %16, %17 : vector<8x128xf32>
    %19 = vector.extract_strided_slice %12 {offsets = [0, 128], sizes = [8, 128], strides = [1, 1]} : vector<8x512xf32> to vector<8x128xf32>
    %20 = math.tanh %19 : vector<8x128xf32>
    %cst_14 = arith.constant 5.000000e-01 : f32
    %21 = vector.broadcast %cst_14 : f32 to vector<8x128xf32>
    %22 = arith.mulf %21, %20 : vector<8x128xf32>
    %cst_15 = arith.constant 5.000000e-01 : f32
    %23 = vector.broadcast %cst_15 : f32 to vector<8x128xf32>
    %24 = arith.addf %22, %23 : vector<8x128xf32>
    %25 = vector.extract_strided_slice %12 {offsets = [0, 256], sizes = [8, 128], strides = [1, 1]} : vector<8x512xf32> to vector<8x128xf32>
    %26 = math.tanh %25 : vector<8x128xf32>
    %27 = vector.extract_strided_slice %12 {offsets = [0, 384], sizes = [8, 128], strides = [1, 1]} : vector<8x512xf32> to vector<8x128xf32>
    %28 = math.tanh %27 : vector<8x128xf32>
    %cst_16 = arith.constant 5.000000e-01 : f32
    %29 = vector.broadcast %cst_16 : f32 to vector<8x128xf32>
    %30 = arith.mulf %29, %28 : vector<8x128xf32>
    %cst_17 = arith.constant 5.000000e-01 : f32
    %31 = vector.broadcast %cst_17 : f32 to vector<8x128xf32>
    %32 = arith.addf %30, %31 : vector<8x128xf32>
    %33 = arith.mulf %24, %5 : vector<8x128xf32>
    %34 = arith.mulf %18, %26 : vector<8x128xf32>
    %35 = arith.addf %33, %34 : vector<8x128xf32>
    %36 = math.tanh %35 : vector<8x128xf32>
    %37 = arith.mulf %32, %36 : vector<8x128xf32>
    %38 = arith.truncf %37 : vector<8x128xf32> to vector<8x128xbf16>
    %c0_18 = arith.constant 0 : index
    %c0_19 = arith.constant 0 : index
    %39 = vector.load %arg10[%c0_18, %c0_19] : memref<8x128xbf16, #tpu.memory_space<vmem>>, vector<8x128xbf16>
    tpu.vector_store %arg10[%c0_18, %c0_19], %38 {strides = array<i32>} : memref<8x128xbf16, #tpu.memory_space<vmem>>, vector<8x128xbf16>,
    %c0_20 = arith.constant 0 : index
    %c0_21 = arith.constant 0 : index
    %40 = vector.load %arg11[%c0_20, %c0_21] : memref<8x128xf32, #tpu.memory_space<vmem>>, vector<8x128xf32>
    tpu.vector_store %arg11[%c0_20, %c0_21], %35 {strides = array<i32>} : memref<8x128xf32, #tpu.memory_space<vmem>>, vector<8x128xf32>,
    %41 = arith.index_cast %c0_i32_4 : i32 to index
    %c0_22 = arith.constant 0 : index
    %c0_23 = arith.constant 0 : index
    %42 = vector.load %arg7[%41, %c0_22, %c0_23] : memref<8x8x128xf32, #tpu.memory_space<vmem>>, vector<1x8x128xf32>
    %43 = vector.shape_cast %42 : vector<1x8x128xf32> to vector<8x128xf32>
    %44 = vector.shape_cast %37 : vector<8x128xf32> to vector<1x8x128xf32>
    tpu.vector_store %arg7[%41, %c0_22, %c0_23], %44 {strides = array<i32>} : memref<8x8x128xf32, #tpu.memory_space<vmem>>, vector<1x8x128xf32>,
    %c1_i32 = arith.constant 1 : i32
    %c0_24 = arith.constant 0 : index
    %c0_25 = arith.constant 0 : index
    %45 = vector.load %arg11[%c0_24, %c0_25] : memref<8x128xf32, #tpu.memory_space<vmem>>, vector<8x128xf32>
    %46 = arith.index_cast %c1_i32 : i32 to index
    %c0_26 = arith.constant 0 : index
    %c0_27 = arith.constant 0 : index
    %47 = vector.load %arg2[%46, %c0_26, %c0_27] : memref<8x8x128xbf16, #tpu.memory_space<vmem>>, vector<1x8x128xbf16>
    %48 = vector.shape_cast %47 : vector<1x8x128xbf16> to vector<8x128xbf16>
    %cst_28 = arith.constant dense<0.000000e+00> : vector<8x512xf32>
    %49 = tpu.matmul %48, %3, %cst_28 {dimension_numbers = #tpu.dot_dimension_numbers<[1], [0], [0], [1], [0, 0, 1, 1], [], []>} : vector<8x128xbf16>, vector<128x512xbf16>, vector<8x512xf32> -> vector<8x512xf32>
    %c0_29 = arith.constant 0 : index
    %c0_30 = arith.constant 0 : index
    %50 = vector.load %arg10[%c0_29, %c0_30] : memref<8x128xbf16, #tpu.memory_space<vmem>>, vector<8x128xbf16>
    %cst_31 = arith.constant dense<0.000000e+00> : vector<8x512xf32>
    %51 = tpu.matmul %50, %4, %cst_31 {dimension_numbers = #tpu.dot_dimension_numbers<[1], [0], [0], [1], [0, 0, 1, 1], [], []>} : vector<8x128xbf16>, vector<128x512xbf16>, vector<8x512xf32> -> vector<8x512xf32>
    %52 = arith.addf %49, %51 : vector<8x512xf32>
    %53 = vector.extract_strided_slice %52 {offsets = [0, 0], sizes = [8, 128], strides = [1, 1]} : vector<8x512xf32> to vector<8x128xf32>
    %54 = math.tanh %53 : vector<8x128xf32>
    %cst_32 = arith.constant 5.000000e-01 : f32
    %55 = vector.broadcast %cst_32 : f32 to vector<8x128xf32>
    %56 = arith.mulf %55, %54 : vector<8x128xf32>
    %cst_33 = arith.constant 5.000000e-01 : f32
    %57 = vector.broadcast %cst_33 : f32 to vector<8x128xf32>
    %58 = arith.addf %56, %57 : vector<8x128xf32>
    %59 = vector.extract_strided_slice %52 {offsets = [0, 128], sizes = [8, 128], strides = [1, 1]} : vector<8x512xf32> to vector<8x128xf32>
    %60 = math.tanh %59 : vector<8x128xf32>
    %cst_34 = arith.constant 5.000000e-01 : f32
    %61 = vector.broadcast %cst_34 : f32 to vector<8x128xf32>
    %62 = arith.mulf %61, %60 : vector<8x128xf32>
    %cst_35 = arith.constant 5.000000e-01 : f32
    %63 = vector.broadcast %cst_35 : f32 to vector<8x128xf32>
    %64 = arith.addf %62, %63 : vector<8x128xf32>
    %65 = vector.extract_strided_slice %52 {offsets = [0, 256], sizes = [8, 128], strides = [1, 1]} : vector<8x512xf32> to vector<8x128xf32>
    %66 = math.tanh %65 : vector<8x128xf32>
    %67 = vector.extract_strided_slice %52 {offsets = [0, 384], sizes = [8, 128], strides = [1, 1]} : vector<8x512xf32> to vector<8x128xf32>
    %68 = math.tanh %67 : vector<8x128xf32>
    %cst_36 = arith.constant 5.000000e-01 : f32
    %69 = vector.broadcast %cst_36 : f32 to vector<8x128xf32>
    %70 = arith.mulf %69, %68 : vector<8x128xf32>
    %cst_37 = arith.constant 5.000000e-01 : f32
    %71 = vector.broadcast %cst_37 : f32 to vector<8x128xf32>
    %72 = arith.addf %70, %71 : vector<8x128xf32>
    %73 = arith.mulf %64, %45 : vector<8x128xf32>
    %74 = arith.mulf %58, %66 : vector<8x128xf32>
    %75 = arith.addf %73, %74 : vector<8x128xf32>
    %76 = math.tanh %75 : vector<8x128xf32>
    %77 = arith.mulf %72, %76 : vector<8x128xf32>
    %78 = arith.truncf %77 : vector<8x128xf32> to vector<8x128xbf16>
    %c0_38 = arith.constant 0 : index
    %c0_39 = arith.constant 0 : index
    %79 = vector.load %arg10[%c0_38, %c0_39] : memref<8x128xbf16, #tpu.memory_space<vmem>>, vector<8x128xbf16>
    tpu.vector_store %arg10[%c0_38, %c0_39], %78 {strides = array<i32>} : memref<8x128xbf16, #tpu.memory_space<vmem>>, vector<8x128xbf16>,
    %c0_40 = arith.constant 0 : index
    %c0_41 = arith.constant 0 : index
    %80 = vector.load %arg11[%c0_40, %c0_41] : memref<8x128xf32, #tpu.memory_space<vmem>>, vector<8x128xf32>
    tpu.vector_store %arg11[%c0_40, %c0_41], %75 {strides = array<i32>} : memref<8x128xf32, #tpu.memory_space<vmem>>, vector<8x128xf32>,
    %81 = arith.index_cast %c1_i32 : i32 to index
    %c0_42 = arith.constant 0 : index
    %c0_43 = arith.constant 0 : index
    %82 = vector.load %arg7[%81, %c0_42, %c0_43] : memref<8x8x128xf32, #tpu.memory_space<vmem>>, vector<1x8x128xf32>
    %83 = vector.shape_cast %82 : vector<1x8x128xf32> to vector<8x128xf32>
    %84 = vector.shape_cast %77 : vector<8x128xf32> to vector<1x8x128xf32>
    tpu.vector_store %arg7[%81, %c0_42, %c0_43], %84 {strides = array<i32>} : memref<8x8x128xf32, #tpu.memory_space<vmem>>, vector<1x8x128xf32>,
    %c2_i32 = arith.constant 2 : i32
    %c0_44 = arith.constant 0 : index
    %c0_45 = arith.constant 0 : index
    %85 = vector.load %arg11[%c0_44, %c0_45] : memref<8x128xf32, #tpu.memory_space<vmem>>, vector<8x128xf32>
    %86 = arith.index_cast %c2_i32 : i32 to index
    %c0_46 = arith.constant 0 : index
    %c0_47 = arith.constant 0 : index
    %87 = vector.load %arg2[%86, %c0_46, %c0_47] : memref<8x8x128xbf16, #tpu.memory_space<vmem>>, vector<1x8x128xbf16>
    %88 = vector.shape_cast %87 : vector<1x8x128xbf16> to vector<8x128xbf16>
    %cst_48 = arith.constant dense<0.000000e+00> : vector<8x512xf32>
    %89 = tpu.matmul %88, %3, %cst_48 {dimension_numbers = #tpu.dot_dimension_numbers<[1], [0], [0], [1], [0, 0, 1, 1], [], []>} : vector<8x128xbf16>, vector<128x512xbf16>, vector<8x512xf32> -> vector<8x512xf32>
    %c0_49 = arith.constant 0 : index
    %c0_50 = arith.constant 0 : index
    %90 = vector.load %arg10[%c0_49, %c0_50] : memref<8x128xbf16, #tpu.memory_space<vmem>>, vector<8x128xbf16>
    %cst_51 = arith.constant dense<0.000000e+00> : vector<8x512xf32>
    %91 = tpu.matmul %90, %4, %cst_51 {dimension_numbers = #tpu.dot_dimension_numbers<[1], [0], [0], [1], [0, 0, 1, 1], [], []>} : vector<8x128xbf16>, vector<128x512xbf16>, vector<8x512xf32> -> vector<8x512xf32>
    %92 = arith.addf %89, %91 : vector<8x512xf32>
    %93 = vector.extract_strided_slice %92 {offsets = [0, 0], sizes = [8, 128], strides = [1, 1]} : vector<8x512xf32> to vector<8x128xf32>
    %94 = math.tanh %93 : vector<8x128xf32>
    %cst_52 = arith.constant 5.000000e-01 : f32
    %95 = vector.broadcast %cst_52 : f32 to vector<8x128xf32>
    %96 = arith.mulf %95, %94 : vector<8x128xf32>
    %cst_53 = arith.constant 5.000000e-01 : f32
    %97 = vector.broadcast %cst_53 : f32 to vector<8x128xf32>
    %98 = arith.addf %96, %97 : vector<8x128xf32>
    %99 = vector.extract_strided_slice %92 {offsets = [0, 128], sizes = [8, 128], strides = [1, 1]} : vector<8x512xf32> to vector<8x128xf32>
    %100 = math.tanh %99 : vector<8x128xf32>
    %cst_54 = arith.constant 5.000000e-01 : f32
    %101 = vector.broadcast %cst_54 : f32 to vector<8x128xf32>
    %102 = arith.mulf %101, %100 : vector<8x128xf32>
    %cst_55 = arith.constant 5.000000e-01 : f32
    %103 = vector.broadcast %cst_55 : f32 to vector<8x128xf32>
    %104 = arith.addf %102, %103 : vector<8x128xf32>
    %105 = vector.extract_strided_slice %92 {offsets = [0, 256], sizes = [8, 128], strides = [1, 1]} : vector<8x512xf32> to vector<8x128xf32>
    %106 = math.tanh %105 : vector<8x128xf32>
    %107 = vector.extract_strided_slice %92 {offsets = [0, 384], sizes = [8, 128], strides = [1, 1]} : vector<8x512xf32> to vector<8x128xf32>
    %108 = math.tanh %107 : vector<8x128xf32>
    %cst_56 = arith.constant 5.000000e-01 : f32
    %109 = vector.broadcast %cst_56 : f32 to vector<8x128xf32>
    %110 = arith.mulf %109, %108 : vector<8x128xf32>
    %cst_57 = arith.constant 5.000000e-01 : f32
    %111 = vector.broadcast %cst_57 : f32 to vector<8x128xf32>
    %112 = arith.addf %110, %111 : vector<8x128xf32>
    %113 = arith.mulf %104, %85 : vector<8x128xf32>
    %114 = arith.mulf %98, %106 : vector<8x128xf32>
    %115 = arith.addf %113, %114 : vector<8x128xf32>
    %116 = math.tanh %115 : vector<8x128xf32>
    %117 = arith.mulf %112, %116 : vector<8x128xf32>
    %118 = arith.truncf %117 : vector<8x128xf32> to vector<8x128xbf16>
    %c0_58 = arith.constant 0 : index
    %c0_59 = arith.constant 0 : index
    %119 = vector.load %arg10[%c0_58, %c0_59] : memref<8x128xbf16, #tpu.memory_space<vmem>>, vector<8x128xbf16>
    tpu.vector_store %arg10[%c0_58, %c0_59], %118 {strides = array<i32>} : memref<8x128xbf16, #tpu.memory_space<vmem>>, vector<8x128xbf16>,
    %c0_60 = arith.constant 0 : index
    %c0_61 = arith.constant 0 : index
    %120 = vector.load %arg11[%c0_60, %c0_61] : memref<8x128xf32, #tpu.memory_space<vmem>>, vector<8x128xf32>
    tpu.vector_store %arg11[%c0_60, %c0_61], %115 {strides = array<i32>} : memref<8x128xf32, #tpu.memory_space<vmem>>, vector<8x128xf32>,
    %121 = arith.index_cast %c2_i32 : i32 to index
    %c0_62 = arith.constant 0 : index
    %c0_63 = arith.constant 0 : index
    %122 = vector.load %arg7[%121, %c0_62, %c0_63] : memref<8x8x128xf32, #tpu.memory_space<vmem>>, vector<1x8x128xf32>
    %123 = vector.shape_cast %122 : vector<1x8x128xf32> to vector<8x128xf32>
    %124 = vector.shape_cast %117 : vector<8x128xf32> to vector<1x8x128xf32>
    tpu.vector_store %arg7[%121, %c0_62, %c0_63], %124 {strides = array<i32>} : memref<8x8x128xf32, #tpu.memory_space<vmem>>, vector<1x8x128xf32>,
    %c3_i32 = arith.constant 3 : i32
    %c0_64 = arith.constant 0 : index
    %c0_65 = arith.constant 0 : index
    %125 = vector.load %arg11[%c0_64, %c0_65] : memref<8x128xf32, #tpu.memory_space<vmem>>, vector<8x128xf32>
    %126 = arith.index_cast %c3_i32 : i32 to index
    %c0_66 = arith.constant 0 : index
    %c0_67 = arith.constant 0 : index
    %127 = vector.load %arg2[%126, %c0_66, %c0_67] : memref<8x8x128xbf16, #tpu.memory_space<vmem>>, vector<1x8x128xbf16>
    %128 = vector.shape_cast %127 : vector<1x8x128xbf16> to vector<8x128xbf16>
    %cst_68 = arith.constant dense<0.000000e+00> : vector<8x512xf32>
    %129 = tpu.matmul %128, %3, %cst_68 {dimension_numbers = #tpu.dot_dimension_numbers<[1], [0], [0], [1], [0, 0, 1, 1], [], []>} : vector<8x128xbf16>, vector<128x512xbf16>, vector<8x512xf32> -> vector<8x512xf32>
    %c0_69 = arith.constant 0 : index
    %c0_70 = arith.constant 0 : index
    %130 = vector.load %arg10[%c0_69, %c0_70] : memref<8x128xbf16, #tpu.memory_space<vmem>>, vector<8x128xbf16>
    %cst_71 = arith.constant dense<0.000000e+00> : vector<8x512xf32>
    %131 = tpu.matmul %130, %4, %cst_71 {dimension_numbers = #tpu.dot_dimension_numbers<[1], [0], [0], [1], [0, 0, 1, 1], [], []>} : vector<8x128xbf16>, vector<128x512xbf16>, vector<8x512xf32> -> vector<8x512xf32>
    %132 = arith.addf %129, %131 : vector<8x512xf32>
    %133 = vector.extract_strided_slice %132 {offsets = [0, 0], sizes = [8, 128], strides = [1, 1]} : vector<8x512xf32> to vector<8x128xf32>
    %134 = math.tanh %133 : vector<8x128xf32>
    %cst_72 = arith.constant 5.000000e-01 : f32
    %135 = vector.broadcast %cst_72 : f32 to vector<8x128xf32>
    %136 = arith.mulf %135, %134 : vector<8x128xf32>
    %cst_73 = arith.constant 5.000000e-01 : f32
    %137 = vector.broadcast %cst_73 : f32 to vector<8x128xf32>
    %138 = arith.addf %136, %137 : vector<8x128xf32>
    %139 = vector.extract_strided_slice %132 {offsets = [0, 128], sizes = [8, 128], strides = [1, 1]} : vector<8x512xf32> to vector<8x128xf32>
    %140 = math.tanh %139 : vector<8x128xf32>
    %cst_74 = arith.constant 5.000000e-01 : f32
    %141 = vector.broadcast %cst_74 : f32 to vector<8x128xf32>
    %142 = arith.mulf %141, %140 : vector<8x128xf32>
    %cst_75 = arith.constant 5.000000e-01 : f32
    %143 = vector.broadcast %cst_75 : f32 to vector<8x128xf32>
    %144 = arith.addf %142, %143 : vector<8x128xf32>
    %145 = vector.extract_strided_slice %132 {offsets = [0, 256], sizes = [8, 128], strides = [1, 1]} : vector<8x512xf32> to vector<8x128xf32>
    %146 = math.tanh %145 : vector<8x128xf32>
    %147 = vector.extract_strided_slice %132 {offsets = [0, 384], sizes = [8, 128], strides = [1, 1]} : vector<8x512xf32> to vector<8x128xf32>
    %148 = math.tanh %147 : vector<8x128xf32>
    %cst_76 = arith.constant 5.000000e-01 : f32
    %149 = vector.broadcast %cst_76 : f32 to vector<8x128xf32>
    %150 = arith.mulf %149, %148 : vector<8x128xf32>
    %cst_77 = arith.constant 5.000000e-01 : f32
    %151 = vector.broadcast %cst_77 : f32 to vector<8x128xf32>
    %152 = arith.addf %150, %151 : vector<8x128xf32>
    %153 = arith.mulf %144, %125 : vector<8x128xf32>
    %154 = arith.mulf %138, %146 : vector<8x128xf32>
    %155 = arith.addf %153, %154 : vector<8x128xf32>
    %156 = math.tanh %155 : vector<8x128xf32>
    %157 = arith.mulf %152, %156 : vector<8x128xf32>
    %158 = arith.truncf %157 : vector<8x128xf32> to vector<8x128xbf16>
    %c0_78 = arith.constant 0 : index
    %c0_79 = arith.constant 0 : index
    %159 = vector.load %arg10[%c0_78, %c0_79] : memref<8x128xbf16, #tpu.memory_space<vmem>>, vector<8x128xbf16>
    tpu.vector_store %arg10[%c0_78, %c0_79], %158 {strides = array<i32>} : memref<8x128xbf16, #tpu.memory_space<vmem>>, vector<8x128xbf16>,
    %c0_80 = arith.constant 0 : index
    %c0_81 = arith.constant 0 : index
    %160 = vector.load %arg11[%c0_80, %c0_81] : memref<8x128xf32, #tpu.memory_space<vmem>>, vector<8x128xf32>
    tpu.vector_store %arg11[%c0_80, %c0_81], %155 {strides = array<i32>} : memref<8x128xf32, #tpu.memory_space<vmem>>, vector<8x128xf32>,
    %161 = arith.index_cast %c3_i32 : i32 to index
    %c0_82 = arith.constant 0 : index
    %c0_83 = arith.constant 0 : index
    %162 = vector.load %arg7[%161, %c0_82, %c0_83] : memref<8x8x128xf32, #tpu.memory_space<vmem>>, vector<1x8x128xf32>
    %163 = vector.shape_cast %162 : vector<1x8x128xf32> to vector<8x128xf32>
    %164 = vector.shape_cast %157 : vector<8x128xf32> to vector<1x8x128xf32>
    tpu.vector_store %arg7[%161, %c0_82, %c0_83], %164 {strides = array<i32>} : memref<8x8x128xf32, #tpu.memory_space<vmem>>, vector<1x8x128xf32>,
    %c4_i32 = arith.constant 4 : i32
    %c0_84 = arith.constant 0 : index
    %c0_85 = arith.constant 0 : index
    %165 = vector.load %arg11[%c0_84, %c0_85] : memref<8x128xf32, #tpu.memory_space<vmem>>, vector<8x128xf32>
    %166 = arith.index_cast %c4_i32 : i32 to index
    %c0_86 = arith.constant 0 : index
    %c0_87 = arith.constant 0 : index
    %167 = vector.load %arg2[%166, %c0_86, %c0_87] : memref<8x8x128xbf16, #tpu.memory_space<vmem>>, vector<1x8x128xbf16>
    %168 = vector.shape_cast %167 : vector<1x8x128xbf16> to vector<8x128xbf16>
    %cst_88 = arith.constant dense<0.000000e+00> : vector<8x512xf32>
    %169 = tpu.matmul %168, %3, %cst_88 {dimension_numbers = #tpu.dot_dimension_numbers<[1], [0], [0], [1], [0, 0, 1, 1], [], []>} : vector<8x128xbf16>, vector<128x512xbf16>, vector<8x512xf32> -> vector<8x512xf32>
    %c0_89 = arith.constant 0 : index
    %c0_90 = arith.constant 0 : index
    %170 = vector.load %arg10[%c0_89, %c0_90] : memref<8x128xbf16, #tpu.memory_space<vmem>>, vector<8x128xbf16>
    %cst_91 = arith.constant dense<0.000000e+00> : vector<8x512xf32>
    %171 = tpu.matmul %170, %4, %cst_91 {dimension_numbers = #tpu.dot_dimension_numbers<[1], [0], [0], [1], [0, 0, 1, 1], [], []>} : vector<8x128xbf16>, vector<128x512xbf16>, vector<8x512xf32> -> vector<8x512xf32>
    %172 = arith.addf %169, %171 : vector<8x512xf32>
    %173 = vector.extract_strided_slice %172 {offsets = [0, 0], sizes = [8, 128], strides = [1, 1]} : vector<8x512xf32> to vector<8x128xf32>
    %174 = math.tanh %173 : vector<8x128xf32>
    %cst_92 = arith.constant 5.000000e-01 : f32
    %175 = vector.broadcast %cst_92 : f32 to vector<8x128xf32>
    %176 = arith.mulf %175, %174 : vector<8x128xf32>
    %cst_93 = arith.constant 5.000000e-01 : f32
    %177 = vector.broadcast %cst_93 : f32 to vector<8x128xf32>
    %178 = arith.addf %176, %177 : vector<8x128xf32>
    %179 = vector.extract_strided_slice %172 {offsets = [0, 128], sizes = [8, 128], strides = [1, 1]} : vector<8x512xf32> to vector<8x128xf32>
    %180 = math.tanh %179 : vector<8x128xf32>
    %cst_94 = arith.constant 5.000000e-01 : f32
    %181 = vector.broadcast %cst_94 : f32 to vector<8x128xf32>
    %182 = arith.mulf %181, %180 : vector<8x128xf32>
    %cst_95 = arith.constant 5.000000e-01 : f32
    %183 = vector.broadcast %cst_95 : f32 to vector<8x128xf32>
    %184 = arith.addf %182, %183 : vector<8x128xf32>
    %185 = vector.extract_strided_slice %172 {offsets = [0, 256], sizes = [8, 128], strides = [1, 1]} : vector<8x512xf32> to vector<8x128xf32>
    %186 = math.tanh %185 : vector<8x128xf32>
    %187 = vector.extract_strided_slice %172 {offsets = [0, 384], sizes = [8, 128], strides = [1, 1]} : vector<8x512xf32> to vector<8x128xf32>
    %188 = math.tanh %187 : vector<8x128xf32>
    %cst_96 = arith.constant 5.000000e-01 : f32
    %189 = vector.broadcast %cst_96 : f32 to vector<8x128xf32>
    %190 = arith.mulf %189, %188 : vector<8x128xf32>
    %cst_97 = arith.constant 5.000000e-01 : f32
    %191 = vector.broadcast %cst_97 : f32 to vector<8x128xf32>
    %192 = arith.addf %190, %191 : vector<8x128xf32>
    %193 = arith.mulf %184, %165 : vector<8x128xf32>
    %194 = arith.mulf %178, %186 : vector<8x128xf32>
    %195 = arith.addf %193, %194 : vector<8x128xf32>
    %196 = math.tanh %195 : vector<8x128xf32>
    %197 = arith.mulf %192, %196 : vector<8x128xf32>
    %198 = arith.truncf %197 : vector<8x128xf32> to vector<8x128xbf16>
    %c0_98 = arith.constant 0 : index
    %c0_99 = arith.constant 0 : index
    %199 = vector.load %arg10[%c0_98, %c0_99] : memref<8x128xbf16, #tpu.memory_space<vmem>>, vector<8x128xbf16>
    tpu.vector_store %arg10[%c0_98, %c0_99], %198 {strides = array<i32>} : memref<8x128xbf16, #tpu.memory_space<vmem>>, vector<8x128xbf16>,
    %c0_100 = arith.constant 0 : index
    %c0_101 = arith.constant 0 : index
    %200 = vector.load %arg11[%c0_100, %c0_101] : memref<8x128xf32, #tpu.memory_space<vmem>>, vector<8x128xf32>
    tpu.vector_store %arg11[%c0_100, %c0_101], %195 {strides = array<i32>} : memref<8x128xf32, #tpu.memory_space<vmem>>, vector<8x128xf32>,
    %201 = arith.index_cast %c4_i32 : i32 to index
    %c0_102 = arith.constant 0 : index
    %c0_103 = arith.constant 0 : index
    %202 = vector.load %arg7[%201, %c0_102, %c0_103] : memref<8x8x128xf32, #tpu.memory_space<vmem>>, vector<1x8x128xf32>
    %203 = vector.shape_cast %202 : vector<1x8x128xf32> to vector<8x128xf32>
    %204 = vector.shape_cast %197 : vector<8x128xf32> to vector<1x8x128xf32>
    tpu.vector_store %arg7[%201, %c0_102, %c0_103], %204 {strides = array<i32>} : memref<8x8x128xf32, #tpu.memory_space<vmem>>, vector<1x8x128xf32>,
    %c5_i32 = arith.constant 5 : i32
    %c0_104 = arith.constant 0 : index
    %c0_105 = arith.constant 0 : index
    %205 = vector.load %arg11[%c0_104, %c0_105] : memref<8x128xf32, #tpu.memory_space<vmem>>, vector<8x128xf32>
    %206 = arith.index_cast %c5_i32 : i32 to index
    %c0_106 = arith.constant 0 : index
    %c0_107 = arith.constant 0 : index
    %207 = vector.load %arg2[%206, %c0_106, %c0_107] : memref<8x8x128xbf16, #tpu.memory_space<vmem>>, vector<1x8x128xbf16>
    %208 = vector.shape_cast %207 : vector<1x8x128xbf16> to vector<8x128xbf16>
    %cst_108 = arith.constant dense<0.000000e+00> : vector<8x512xf32>
    %209 = tpu.matmul %208, %3, %cst_108 {dimension_numbers = #tpu.dot_dimension_numbers<[1], [0], [0], [1], [0, 0, 1, 1], [], []>} : vector<8x128xbf16>, vector<128x512xbf16>, vector<8x512xf32> -> vector<8x512xf32>
    %c0_109 = arith.constant 0 : index
    %c0_110 = arith.constant 0 : index
    %210 = vector.load %arg10[%c0_109, %c0_110] : memref<8x128xbf16, #tpu.memory_space<vmem>>, vector<8x128xbf16>
    %cst_111 = arith.constant dense<0.000000e+00> : vector<8x512xf32>
    %211 = tpu.matmul %210, %4, %cst_111 {dimension_numbers = #tpu.dot_dimension_numbers<[1], [0], [0], [1], [0, 0, 1, 1], [], []>} : vector<8x128xbf16>, vector<128x512xbf16>, vector<8x512xf32> -> vector<8x512xf32>
    %212 = arith.addf %209, %211 : vector<8x512xf32>
    %213 = vector.extract_strided_slice %212 {offsets = [0, 0], sizes = [8, 128], strides = [1, 1]} : vector<8x512xf32> to vector<8x128xf32>
    %214 = math.tanh %213 : vector<8x128xf32>
    %cst_112 = arith.constant 5.000000e-01 : f32
    %215 = vector.broadcast %cst_112 : f32 to vector<8x128xf32>
    %216 = arith.mulf %215, %214 : vector<8x128xf32>
    %cst_113 = arith.constant 5.000000e-01 : f32
    %217 = vector.broadcast %cst_113 : f32 to vector<8x128xf32>
    %218 = arith.addf %216, %217 : vector<8x128xf32>
    %219 = vector.extract_strided_slice %212 {offsets = [0, 128], sizes = [8, 128], strides = [1, 1]} : vector<8x512xf32> to vector<8x128xf32>
    %220 = math.tanh %219 : vector<8x128xf32>
    %cst_114 = arith.constant 5.000000e-01 : f32
    %221 = vector.broadcast %cst_114 : f32 to vector<8x128xf32>
    %222 = arith.mulf %221, %220 : vector<8x128xf32>
    %cst_115 = arith.constant 5.000000e-01 : f32
    %223 = vector.broadcast %cst_115 : f32 to vector<8x128xf32>
    %224 = arith.addf %222, %223 : vector<8x128xf32>
    %225 = vector.extract_strided_slice %212 {offsets = [0, 256], sizes = [8, 128], strides = [1, 1]} : vector<8x512xf32> to vector<8x128xf32>
    %226 = math.tanh %225 : vector<8x128xf32>
    %227 = vector.extract_strided_slice %212 {offsets = [0, 384], sizes = [8, 128], strides = [1, 1]} : vector<8x512xf32> to vector<8x128xf32>
    %228 = math.tanh %227 : vector<8x128xf32>
    %cst_116 = arith.constant 5.000000e-01 : f32
    %229 = vector.broadcast %cst_116 : f32 to vector<8x128xf32>
    %230 = arith.mulf %229, %228 : vector<8x128xf32>
    %cst_117 = arith.constant 5.000000e-01 : f32
    %231 = vector.broadcast %cst_117 : f32 to vector<8x128xf32>
    %232 = arith.addf %230, %231 : vector<8x128xf32>
    %233 = arith.mulf %224, %205 : vector<8x128xf32>
    %234 = arith.mulf %218, %226 : vector<8x128xf32>
    %235 = arith.addf %233, %234 : vector<8x128xf32>
    %236 = math.tanh %235 : vector<8x128xf32>
    %237 = arith.mulf %232, %236 : vector<8x128xf32>
    %238 = arith.truncf %237 : vector<8x128xf32> to vector<8x128xbf16>
    %c0_118 = arith.constant 0 : index
    %c0_119 = arith.constant 0 : index
    %239 = vector.load %arg10[%c0_118, %c0_119] : memref<8x128xbf16, #tpu.memory_space<vmem>>, vector<8x128xbf16>
    tpu.vector_store %arg10[%c0_118, %c0_119], %238 {strides = array<i32>} : memref<8x128xbf16, #tpu.memory_space<vmem>>, vector<8x128xbf16>,
    %c0_120 = arith.constant 0 : index
    %c0_121 = arith.constant 0 : index
    %240 = vector.load %arg11[%c0_120, %c0_121] : memref<8x128xf32, #tpu.memory_space<vmem>>, vector<8x128xf32>
    tpu.vector_store %arg11[%c0_120, %c0_121], %235 {strides = array<i32>} : memref<8x128xf32, #tpu.memory_space<vmem>>, vector<8x128xf32>,
    %241 = arith.index_cast %c5_i32 : i32 to index
    %c0_122 = arith.constant 0 : index
    %c0_123 = arith.constant 0 : index
    %242 = vector.load %arg7[%241, %c0_122, %c0_123] : memref<8x8x128xf32, #tpu.memory_space<vmem>>, vector<1x8x128xf32>
    %243 = vector.shape_cast %242 : vector<1x8x128xf32> to vector<8x128xf32>
    %244 = vector.shape_cast %237 : vector<8x128xf32> to vector<1x8x128xf32>
    tpu.vector_store %arg7[%241, %c0_122, %c0_123], %244 {strides = array<i32>} : memref<8x8x128xf32, #tpu.memory_space<vmem>>, vector<1x8x128xf32>,
    %c6_i32 = arith.constant 6 : i32
    %c0_124 = arith.constant 0 : index
    %c0_125 = arith.constant 0 : index
    %245 = vector.load %arg11[%c0_124, %c0_125] : memref<8x128xf32, #tpu.memory_space<vmem>>, vector<8x128xf32>
    %246 = arith.index_cast %c6_i32 : i32 to index
    %c0_126 = arith.constant 0 : index
    %c0_127 = arith.constant 0 : index
    %247 = vector.load %arg2[%246, %c0_126, %c0_127] : memref<8x8x128xbf16, #tpu.memory_space<vmem>>, vector<1x8x128xbf16>
    %248 = vector.shape_cast %247 : vector<1x8x128xbf16> to vector<8x128xbf16>
    %cst_128 = arith.constant dense<0.000000e+00> : vector<8x512xf32>
    %249 = tpu.matmul %248, %3, %cst_128 {dimension_numbers = #tpu.dot_dimension_numbers<[1], [0], [0], [1], [0, 0, 1, 1], [], []>} : vector<8x128xbf16>, vector<128x512xbf16>, vector<8x512xf32> -> vector<8x512xf32>
    %c0_129 = arith.constant 0 : index
    %c0_130 = arith.constant 0 : index
    %250 = vector.load %arg10[%c0_129, %c0_130] : memref<8x128xbf16, #tpu.memory_space<vmem>>, vector<8x128xbf16>
    %cst_131 = arith.constant dense<0.000000e+00> : vector<8x512xf32>
    %251 = tpu.matmul %250, %4, %cst_131 {dimension_numbers = #tpu.dot_dimension_numbers<[1], [0], [0], [1], [0, 0, 1, 1], [], []>} : vector<8x128xbf16>, vector<128x512xbf16>, vector<8x512xf32> -> vector<8x512xf32>
    %252 = arith.addf %249, %251 : vector<8x512xf32>
    %253 = vector.extract_strided_slice %252 {offsets = [0, 0], sizes = [8, 128], strides = [1, 1]} : vector<8x512xf32> to vector<8x128xf32>
    %254 = math.tanh %253 : vector<8x128xf32>
    %cst_132 = arith.constant 5.000000e-01 : f32
    %255 = vector.broadcast %cst_132 : f32 to vector<8x128xf32>
    %256 = arith.mulf %255, %254 : vector<8x128xf32>
    %cst_133 = arith.constant 5.000000e-01 : f32
    %257 = vector.broadcast %cst_133 : f32 to vector<8x128xf32>
    %258 = arith.addf %256, %257 : vector<8x128xf32>
    %259 = vector.extract_strided_slice %252 {offsets = [0, 128], sizes = [8, 128], strides = [1, 1]} : vector<8x512xf32> to vector<8x128xf32>
    %260 = math.tanh %259 : vector<8x128xf32>
    %cst_134 = arith.constant 5.000000e-01 : f32
    %261 = vector.broadcast %cst_134 : f32 to vector<8x128xf32>
    %262 = arith.mulf %261, %260 : vector<8x128xf32>
    %cst_135 = arith.constant 5.000000e-01 : f32
    %263 = vector.broadcast %cst_135 : f32 to vector<8x128xf32>
    %264 = arith.addf %262, %263 : vector<8x128xf32>
    %265 = vector.extract_strided_slice %252 {offsets = [0, 256], sizes = [8, 128], strides = [1, 1]} : vector<8x512xf32> to vector<8x128xf32>
    %266 = math.tanh %265 : vector<8x128xf32>
    %267 = vector.extract_strided_slice %252 {offsets = [0, 384], sizes = [8, 128], strides = [1, 1]} : vector<8x512xf32> to vector<8x128xf32>
    %268 = math.tanh %267 : vector<8x128xf32>
    %cst_136 = arith.constant 5.000000e-01 : f32
    %269 = vector.broadcast %cst_136 : f32 to vector<8x128xf32>
    %270 = arith.mulf %269, %268 : vector<8x128xf32>
    %cst_137 = arith.constant 5.000000e-01 : f32
    %271 = vector.broadcast %cst_137 : f32 to vector<8x128xf32>
    %272 = arith.addf %270, %271 : vector<8x128xf32>
    %273 = arith.mulf %264, %245 : vector<8x128xf32>
    %274 = arith.mulf %258, %266 : vector<8x128xf32>
    %275 = arith.addf %273, %274 : vector<8x128xf32>
    %276 = math.tanh %275 : vector<8x128xf32>
    %277 = arith.mulf %272, %276 : vector<8x128xf32>
    %278 = arith.truncf %277 : vector<8x128xf32> to vector<8x128xbf16>
    %c0_138 = arith.constant 0 : index
    %c0_139 = arith.constant 0 : index
    %279 = vector.load %arg10[%c0_138, %c0_139] : memref<8x128xbf16, #tpu.memory_space<vmem>>, vector<8x128xbf16>
    tpu.vector_store %arg10[%c0_138, %c0_139], %278 {strides = array<i32>} : memref<8x128xbf16, #tpu.memory_space<vmem>>, vector<8x128xbf16>,
    %c0_140 = arith.constant 0 : index
    %c0_141 = arith.constant 0 : index
    %280 = vector.load %arg11[%c0_140, %c0_141] : memref<8x128xf32, #tpu.memory_space<vmem>>, vector<8x128xf32>
    tpu.vector_store %arg11[%c0_140, %c0_141], %275 {strides = array<i32>} : memref<8x128xf32, #tpu.memory_space<vmem>>, vector<8x128xf32>,
    %281 = arith.index_cast %c6_i32 : i32 to index
    %c0_142 = arith.constant 0 : index
    %c0_143 = arith.constant 0 : index
    %282 = vector.load %arg7[%281, %c0_142, %c0_143] : memref<8x8x128xf32, #tpu.memory_space<vmem>>, vector<1x8x128xf32>
    %283 = vector.shape_cast %282 : vector<1x8x128xf32> to vector<8x128xf32>
    %284 = vector.shape_cast %277 : vector<8x128xf32> to vector<1x8x128xf32>
    tpu.vector_store %arg7[%281, %c0_142, %c0_143], %284 {strides = array<i32>} : memref<8x8x128xf32, #tpu.memory_space<vmem>>, vector<1x8x128xf32>,
    %c7_i32 = arith.constant 7 : i32
    %c0_144 = arith.constant 0 : index
    %c0_145 = arith.constant 0 : index
    %285 = vector.load %arg11[%c0_144, %c0_145] : memref<8x128xf32, #tpu.memory_space<vmem>>, vector<8x128xf32>
    %286 = arith.index_cast %c7_i32 : i32 to index
    %c0_146 = arith.constant 0 : index
    %c0_147 = arith.constant 0 : index
    %287 = vector.load %arg2[%286, %c0_146, %c0_147] : memref<8x8x128xbf16, #tpu.memory_space<vmem>>, vector<1x8x128xbf16>
    %288 = vector.shape_cast %287 : vector<1x8x128xbf16> to vector<8x128xbf16>
    %cst_148 = arith.constant dense<0.000000e+00> : vector<8x512xf32>
    %289 = tpu.matmul %288, %3, %cst_148 {dimension_numbers = #tpu.dot_dimension_numbers<[1], [0], [0], [1], [0, 0, 1, 1], [], []>} : vector<8x128xbf16>, vector<128x512xbf16>, vector<8x512xf32> -> vector<8x512xf32>
    %c0_149 = arith.constant 0 : index
    %c0_150 = arith.constant 0 : index
    %290 = vector.load %arg10[%c0_149, %c0_150] : memref<8x128xbf16, #tpu.memory_space<vmem>>, vector<8x128xbf16>
    %cst_151 = arith.constant dense<0.000000e+00> : vector<8x512xf32>
    %291 = tpu.matmul %290, %4, %cst_151 {dimension_numbers = #tpu.dot_dimension_numbers<[1], [0], [0], [1], [0, 0, 1, 1], [], []>} : vector<8x128xbf16>, vector<128x512xbf16>, vector<8x512xf32> -> vector<8x512xf32>
    %292 = arith.addf %289, %291 : vector<8x512xf32>
    %293 = vector.extract_strided_slice %292 {offsets = [0, 0], sizes = [8, 128], strides = [1, 1]} : vector<8x512xf32> to vector<8x128xf32>
    %294 = math.tanh %293 : vector<8x128xf32>
    %cst_152 = arith.constant 5.000000e-01 : f32
    %295 = vector.broadcast %cst_152 : f32 to vector<8x128xf32>
    %296 = arith.mulf %295, %294 : vector<8x128xf32>
    %cst_153 = arith.constant 5.000000e-01 : f32
    %297 = vector.broadcast %cst_153 : f32 to vector<8x128xf32>
    %298 = arith.addf %296, %297 : vector<8x128xf32>
    %299 = vector.extract_strided_slice %292 {offsets = [0, 128], sizes = [8, 128], strides = [1, 1]} : vector<8x512xf32> to vector<8x128xf32>
    %300 = math.tanh %299 : vector<8x128xf32>
    %cst_154 = arith.constant 5.000000e-01 : f32
    %301 = vector.broadcast %cst_154 : f32 to vector<8x128xf32>
    %302 = arith.mulf %301, %300 : vector<8x128xf32>
    %cst_155 = arith.constant 5.000000e-01 : f32
    %303 = vector.broadcast %cst_155 : f32 to vector<8x128xf32>
    %304 = arith.addf %302, %303 : vector<8x128xf32>
    %305 = vector.extract_strided_slice %292 {offsets = [0, 256], sizes = [8, 128], strides = [1, 1]} : vector<8x512xf32> to vector<8x128xf32>
    %306 = math.tanh %305 : vector<8x128xf32>
    %307 = vector.extract_strided_slice %292 {offsets = [0, 384], sizes = [8, 128], strides = [1, 1]} : vector<8x512xf32> to vector<8x128xf32>
    %308 = math.tanh %307 : vector<8x128xf32>
    %cst_156 = arith.constant 5.000000e-01 : f32
    %309 = vector.broadcast %cst_156 : f32 to vector<8x128xf32>
    %310 = arith.mulf %309, %308 : vector<8x128xf32>
    %cst_157 = arith.constant 5.000000e-01 : f32
    %311 = vector.broadcast %cst_157 : f32 to vector<8x128xf32>
    %312 = arith.addf %310, %311 : vector<8x128xf32>
    %313 = arith.mulf %304, %285 : vector<8x128xf32>
    %314 = arith.mulf %298, %306 : vector<8x128xf32>
    %315 = arith.addf %313, %314 : vector<8x128xf32>
    %316 = math.tanh %315 : vector<8x128xf32>
    %317 = arith.mulf %312, %316 : vector<8x128xf32>
    %318 = arith.truncf %317 : vector<8x128xf32> to vector<8x128xbf16>
    %c0_158 = arith.constant 0 : index
    %c0_159 = arith.constant 0 : index
    %319 = vector.load %arg10[%c0_158, %c0_159] : memref<8x128xbf16, #tpu.memory_space<vmem>>, vector<8x128xbf16>
    tpu.vector_store %arg10[%c0_158, %c0_159], %318 {strides = array<i32>} : memref<8x128xbf16, #tpu.memory_space<vmem>>, vector<8x128xbf16>,
    %c0_160 = arith.constant 0 : index
    %c0_161 = arith.constant 0 : index
    %320 = vector.load %arg11[%c0_160, %c0_161] : memref<8x128xf32, #tpu.memory_space<vmem>>, vector<8x128xf32>
    tpu.vector_store %arg11[%c0_160, %c0_161], %315 {strides = array<i32>} : memref<8x128xf32, #tpu.memory_space<vmem>>, vector<8x128xf32>,
    %321 = arith.index_cast %c7_i32 : i32 to index
    %c0_162 = arith.constant 0 : index
    %c0_163 = arith.constant 0 : index
    %322 = vector.load %arg7[%321, %c0_162, %c0_163] : memref<8x8x128xf32, #tpu.memory_space<vmem>>, vector<1x8x128xf32>
    %323 = vector.shape_cast %322 : vector<1x8x128xf32> to vector<8x128xf32>
    %324 = vector.shape_cast %317 : vector<8x128xf32> to vector<1x8x128xf32>
    tpu.vector_store %arg7[%321, %c0_162, %c0_163], %324 {strides = array<i32>} : memref<8x8x128xf32, #tpu.memory_space<vmem>>, vector<1x8x128xf32>,
    %c8_i32 = arith.constant 8 : i32
    %c0_i32_164 = arith.constant 0 : i32
    %325 = arith.cmpi eq, %arg1, %c0_i32_164 : i32
    %326 = arith.extui %325 : i1 to i32
    %c0_i32_165 = arith.constant 0 : i32
    %327 = arith.cmpi ne, %326, %c0_i32_165 : i32
    scf.if %327 {
      %c0_166 = arith.constant 0 : index
      %c0_167 = arith.constant 0 : index
      %328 = vector.load %arg10[%c0_166, %c0_167] : memref<8x128xbf16, #tpu.memory_space<vmem>>, vector<8x128xbf16>
      %329 = arith.extf %328 : vector<8x128xbf16> to vector<8x128xf32>
      %c0_168 = arith.constant 0 : index
      %c0_169 = arith.constant 0 : index
      %c0_170 = arith.constant 0 : index
      %330 = vector.load %arg8[%c0_168, %c0_169, %c0_170] : memref<1x8x128xf32, #tpu.memory_space<vmem>>, vector<1x8x128xf32>
      %331 = vector.shape_cast %330 : vector<1x8x128xf32> to vector<8x128xf32>
      %332 = vector.shape_cast %329 : vector<8x128xf32> to vector<1x8x128xf32>
      tpu.vector_store %arg8[%c0_168, %c0_169, %c0_170], %332 {strides = array<i32>} : memref<1x8x128xf32, #tpu.memory_space<vmem>>, vector<1x8x128xf32>,
      %c0_171 = arith.constant 0 : index
      %c0_172 = arith.constant 0 : index
      %333 = vector.load %arg11[%c0_171, %c0_172] : memref<8x128xf32, #tpu.memory_space<vmem>>, vector<8x128xf32>
      %c0_173 = arith.constant 0 : index
      %c0_174 = arith.constant 0 : index
      %c0_175 = arith.constant 0 : index
      %334 = vector.load %arg9[%c0_173, %c0_174, %c0_175] : memref<1x8x128xf32, #tpu.memory_space<vmem>>, vector<1x8x128xf32>
      %335 = vector.shape_cast %334 : vector<1x8x128xf32> to vector<8x128xf32>
      %336 = vector.shape_cast %333 : vector<8x128xf32> to vector<1x8x128xf32>
      tpu.vector_store %arg9[%c0_173, %c0_174, %c0_175], %336 {strides = array<i32>} : memref<1x8x128xf32, #tpu.memory_space<vmem>>, vector<1x8x128xf32>,
    } else {
    }
    return
  }
  func.func @transform_0(%arg0: i32, %arg1: i32) -> (i32, i32, i32) {
    %c0_i32 = arith.constant 0 : i32
    %c0_i32_0 = arith.constant 0 : i32
    return %arg1, %arg0, %c0_i32 : i32, i32, i32
  }
  func.func @transform_1(%arg0: i32, %arg1: i32) -> (i32, i32) {
    %c0_i32 = arith.constant 0 : i32
    %c0_i32_0 = arith.constant 0 : i32
    %c0_i32_1 = arith.constant 0 : i32
    return %c0_i32, %c0_i32_0 : i32, i32
  }
  func.func @transform_2(%arg0: i32, %arg1: i32) -> (i32, i32) {
    %c0_i32 = arith.constant 0 : i32
    %c0_i32_0 = arith.constant 0 : i32
    %c0_i32_1 = arith.constant 0 : i32
    return %c0_i32, %c0_i32_0 : i32, i32
  }
  func.func @transform_3(%arg0: i32, %arg1: i32) -> (i32, i32, i32) {
    %c0_i32 = arith.constant 0 : i32
    %c0_i32_0 = arith.constant 0 : i32
    %c0_i32_1 = arith.constant 0 : i32
    return %c0_i32, %arg0, %c0_i32_0 : i32, i32, i32
  }
  func.func @transform_4(%arg0: i32, %arg1: i32) -> (i32, i32, i32) {
    %c0_i32 = arith.constant 0 : i32
    %c0_i32_0 = arith.constant 0 : i32
    %c0_i32_1 = arith.constant 0 : i32
    return %c0_i32, %arg0, %c0_i32_0 : i32, i32, i32
  }
  func.func @transform_5(%arg0: i32, %arg1: i32) -> (i32, i32, i32) {
    %c0_i32 = arith.constant 0 : i32
    %c0_i32_0 = arith.constant 0 : i32
    return %arg1, %arg0, %c0_i32 : i32, i32, i32
  }
  func.func @transform_6(%arg0: i32, %arg1: i32) -> (i32, i32, i32) {
    %c0_i32 = arith.constant 0 : i32
    %c0_i32_0 = arith.constant 0 : i32
    %c0_i32_1 = arith.constant 0 : i32
    return %c0_i32, %arg0, %c0_i32_0 : i32, i32, i32
  }
  func.func @transform_7(%arg0: i32, %arg1: i32) -> (i32, i32, i32) {
    %c0_i32 = arith.constant 0 : i32
    %c0_i32_0 = arith.constant 0 : i32
    %c0_i32_1 = arith.constant 0 : i32
    return %c0_i32, %arg0, %c0_i32_0 : i32, i32, i32
  }
}

</mosaic_0001>

<bundles_post_ra>
// kernel: lstm_pallas.1
= control target key start
LH: loop header
LB: loop body
LE: loop exit
PB: predicated region body
PF: predicated region fallthrough
CT: control target
= control target key end

     0   :  { %v3643_v1 = vmov 0   ;;  %s3635_s2 = inlined_call_operand.vmem [shape: bf16[128,512], index: 2, kind: input, shape index: {}]   ;;  %s3636_s1 = inlined_call_operand.vmem [shape: bf16[128,512], index: 1, kind: input, shape index: {}]   ;;  %s3637_s3 = inlined_call_operand.vmem [shape: f32[1,8,128], index: 3, kind: input, shape index: {}]   ;;  %s3638_s0 = inlined_call_operand.vmem [shape: bf16[8,8,128], index: 0, kind: input, shape index: {}]   ;;  %s3639_s4 = inlined_call_operand.vmem [shape: f32[1,8,128], index: 4, kind: input, shape index: {}]   ;;  %s3640_s5 = inlined_call_operand.vmem [shape: f32[8,8,128], index: 5, kind: output, shape index: {0}]   ;;  %s3641_s7 = inlined_call_operand.vmem [shape: f32[1,8,128], index: 7, kind: output, shape index: {2}]   ;;  %s3642_s6 = inlined_call_operand.vmem [shape: f32[1,8,128], index: 6, kind: output, shape index: {1}]  }
   0x1   :  { %v2366_v0 = vld [vmem:[%s3635_s2 + $0x4] ss:$16 sps:$4 sm:$0xff]   ;;  %292 = vmatprep.mubr.bf16.mxu0 %v3643_v1  ;;  %333 = vmatprep.mubr.bf16.mxu1 %v3643_v1  ;;  %v2373_v2 = vld [vmem:[%s3635_s2 + $0xc] ss:$16 sps:$4 sm:$0xff]   ;;  %v2379_v3 = vld [vmem:[%s3635_s2] ss:$16 sps:$4 sm:$0xff]  }
   0x2   :  { %260 = vmatprep.subr.bf16.mxu0 %v2366_v0  ;;  %v2384_v4 = vld [vmem:[%s3635_s2 + $0x8] ss:$16 sps:$4 sm:$0xff]   ;;  %301 = vmatprep.subr.bf16.mxu1 %v2373_v2  ;;  %v2390_v5 = vld [vmem:[%s3635_s2 + $0x24] ss:$16 sps:$4 sm:$0xff]   ;;  %v2397_v6 = vld [vmem:[%s3635_s2 + $0x2c] ss:$16 sps:$4 sm:$0xff]  }
   0x3   :  { %261 = vmatpush1.bf16.msra.mxu0 %v2379_v3  ;;  %302 = vmatpush1.bf16.msra.mxu1 %v2384_v4  ;;  %v2402_v7 = vld [vmem:[%s3635_s2 + $0x20] ss:$16 sps:$4 sm:$0xff]   ;;  %v2408_v8 = vld [vmem:[%s3635_s2 + $0x28] ss:$16 sps:$4 sm:$0xff]   ;;  %v2414_v9 = vld [vmem:[%s3635_s2 + $0x44] ss:$16 sps:$4 sm:$0xff]  }
   0x4   :  { %262 = vmatprep.subr.bf16.mxu0 %v2390_v5  ;;  %303 = vmatprep.subr.bf16.mxu1 %v2397_v6  ;;  %v2419_v10 = vld [vmem:[%s3635_s2 + $0x4c] ss:$16 sps:$4 sm:$0xff]   ;;  %v2424_v11 = vld [vmem:[%s3635_s2 + $0x40] ss:$16 sps:$4 sm:$0xff]   ;;  %v2429_v12 = vld [vmem:[%s3635_s2 + $0x48] ss:$16 sps:$4 sm:$0xff]  }
   0x5   :  { %v2436_v13 = vld [vmem:[%s3635_s2 + $0x64] ss:$16 sps:$4 sm:$0xff]   ;;  %v2443_v14 = vld [vmem:[%s3635_s2 + $0x6c] ss:$16 sps:$4 sm:$0xff]   ;;  %v2448_v15 = vld [vmem:[%s3635_s2 + $0x60] ss:$16 sps:$4 sm:$0xff]  }
   0x6   :  { %v2455_v16 = vld [vmem:[%s3635_s2 + $0x68] ss:$16 sps:$4 sm:$0xff]   ;;  %v2460_v17 = vld [vmem:[%s3635_s2 + $0x84] ss:$16 sps:$4 sm:$0xff]   ;;  %v2467_v18 = vld [vmem:[%s3635_s2 + $0x8c] ss:$16 sps:$4 sm:$0xff]  }
   0x7   :  { %263 = vmatpush1.bf16.msra.mxu0 %v2402_v7  ;;  %304 = vmatpush1.bf16.msra.mxu1 %v2408_v8  ;;  %3709 = vst [vmem:[#allocation4_spill] sm:$0xff] %v2455_v16  ;;  %3710 = vst [vmem:[#allocation5_spill] sm:$0xff] %v2460_v17  ;;  %v2472_v19 = vld [vmem:[%s3635_s2 + $0x80] ss:$16 sps:$4 sm:$0xff]   ;;  %v2477_v20 = vld [vmem:[%s3635_s2 + $0x88] ss:$16 sps:$4 sm:$0xff]  }
   0x8   :  { %264 = vmatprep.subr.bf16.mxu0 %v2414_v9  ;;  %305 = vmatprep.subr.bf16.mxu1 %v2419_v10  ;;  %3711 = vst [vmem:[#allocation6_spill] sm:$0xff] %v2467_v18  ;;  %3712 = vst [vmem:[#allocation7_spill] sm:$0xff] %v2472_v19  ;;  %v2484_v21 = vld [vmem:[%s3635_s2 + $0xa4] ss:$16 sps:$4 sm:$0xff]   ;;  %v2491_v22 = vld [vmem:[%s3635_s2 + $0xac] ss:$16 sps:$4 sm:$0xff]  }
   0x9   :  { %3713 = vst [vmem:[#allocation8_spill] sm:$0xff] %v2477_v20  ;;  %3714 = vst [vmem:[#allocation9_spill] sm:$0xff] %v2484_v21  ;;  %v2496_v23 = vld [vmem:[%s3635_s2 + $0xa0] ss:$16 sps:$4 sm:$0xff]   ;;  %v2503_v24 = vld [vmem:[%s3635_s2 + $0xa8] ss:$16 sps:$4 sm:$0xff]  }
   0xa   :  { %3715 = vst [vmem:[#allocation10_spill] sm:$0xff] %v2491_v22  ;;  %3716 = vst [vmem:[#allocation11_spill] sm:$0xff] %v2496_v23  ;;  %v2508_v25 = vld [vmem:[%s3635_s2 + $0xc4] ss:$16 sps:$4 sm:$0xff]   ;;  %v2515_v26 = vld [vmem:[%s3635_s2 + $0xcc] ss:$16 sps:$4 sm:$0xff]  }
   0xb   :  { %265 = vmatpush1.bf16.msra.mxu0 %v2424_v11  ;;  %306 = vmatpush1.bf16.msra.mxu1 %v2429_v12  ;;  %3717 = vst [vmem:[#allocation12_spill] sm:$0xff] %v2503_v24  ;;  %3718 = vst [vmem:[#allocation13_spill] sm:$0xff] %v2508_v25  ;;  %v2520_v27 = vld [vmem:[%s3635_s2 + $0xc0] ss:$16 sps:$4 sm:$0xff]   ;;  %v2525_v28 = vld [vmem:[%s3635_s2 + $0xc8] ss:$16 sps:$4 sm:$0xff]  }
   0xc   :  { %266 = vmatprep.subr.bf16.mxu0 %v2436_v13  ;;  %307 = vmatprep.subr.bf16.mxu1 %v2443_v14  ;;  %3719 = vst [vmem:[#allocation14_spill] sm:$0xff] %v2515_v26  ;;  %3720 = vst [vmem:[#allocation15_spill] sm:$0xff] %v2520_v27  ;;  %v28_v29 = vld [vmem:[%s3637_s3] sm:$0xff]  ;;  %v2542_v32 = vld [vmem:[%s3635_s2 + $0xec] ss:$16 sps:$4 sm:$0xff]  }
   0xd   :  { %3721 = vst [vmem:[#allocation16_spill] sm:$0xff] %v2525_v28  ;;  %v2535_v30 = vld [vmem:[%s3635_s2 + $0xe4] ss:$16 sps:$4 sm:$0xff]   ;;  %v29_v31 = vpack.c.bf16 %v28_v29, %v28_v29  ;;  %3723 = vst [vmem:[#allocation18_spill] sm:$0xff] %v2542_v32  ;;  %v2547_v33 = vld [vmem:[%s3635_s2 + $0xe0] ss:$16 sps:$4 sm:$0xff]  }
   0xe   :  { %3722 = vst [vmem:[#allocation17_spill] sm:$0xff] %v2535_v30  ;;  %3724 = vst [vmem:[#allocation19_spill] sm:$0xff] %v2547_v33  ;;  %v2554_v34 = vld [vmem:[%s3635_s2 + $0xe8] ss:$16 sps:$4 sm:$0xff]   ;;  %v2561_v35 = vld [vmem:[%s3636_s1 + $0x4] ss:$16 sps:$4 sm:$0xff]  }
   0xf   :  { %267 = vmatpush1.bf16.msra.mxu0 %v2448_v15  ;;  %308 = vmatpush1.bf16.msra.mxu1 %v2455_v16  ;;  %30 = vst [vmem:[#allocation2] sm:$0xf] %v29_v31  ;;  %3725 = vst [vmem:[#allocation20_spill] sm:$0xff] %v2554_v34  ;;  %v2566_v36 = vld [vmem:[%s3636_s1 + $0xc] ss:$16 sps:$4 sm:$0xff]  }
  0x10   :  { %268 = vmatprep.subr.bf16.mxu0 %v2460_v17  ;;  %309 = vmatprep.subr.bf16.mxu1 %v2467_v18  ;;  %3726 = vst [vmem:[#allocation21_spill] sm:$0xff] %v2561_v35  ;;  %3727 = vst [vmem:[#allocation22_spill] sm:$0xff] %v2566_v36  ;;  %v2571_v37 = vld [vmem:[%s3636_s1] ss:$16 sps:$4 sm:$0xff]   ;;  %v2576_v38 = vld [vmem:[%s3636_s1 + $0x8] ss:$16 sps:$4 sm:$0xff]  }
  0x11   :  { %v2583_v39 = vld [vmem:[%s3636_s1 + $0x24] ss:$16 sps:$4 sm:$0xff]   ;;  %v2590_v41 = vld [vmem:[%s3636_s1 + $0x2c] ss:$16 sps:$4 sm:$0xff]   ;;  %v2595_v42 = vld [vmem:[%s3636_s1 + $0x20] ss:$16 sps:$4 sm:$0xff]  }
  0x12   :  { %v2602_v43 = vld [vmem:[%s3636_s1 + $0x28] ss:$16 sps:$4 sm:$0xff]   ;;  %v2609_v44 = vld [vmem:[%s3636_s1 + $0x44] ss:$16 sps:$4 sm:$0xff]   ;;  %v2614_v45 = vld [vmem:[%s3636_s1 + $0x4c] ss:$16 sps:$4 sm:$0xff]  }
  0x13   :  { %269 = vmatpush1.bf16.msra.mxu0 %v2472_v19  ;;  %310 = vmatpush1.bf16.msra.mxu1 %v2477_v20  ;;  %v2621_v46 = vld [vmem:[%s3636_s1 + $0x40] ss:$16 sps:$4 sm:$0xff]   ;;  %v2628_v47 = vld [vmem:[%s3636_s1 + $0x48] ss:$16 sps:$4 sm:$0xff]   ;;  %v2633_v48 = vld [vmem:[%s3636_s1 + $0x64] ss:$16 sps:$4 sm:$0xff]  }
  0x14   :  { %270 = vmatprep.subr.bf16.mxu0 %v2484_v21  ;;  %311 = vmatprep.subr.bf16.mxu1 %v2491_v22  ;;  %v2640_v49 = vld [vmem:[%s3636_s1 + $0x6c] ss:$16 sps:$4 sm:$0xff]   ;;  %v2647_v50 = vld [vmem:[%s3636_s1 + $0x60] ss:$16 sps:$4 sm:$0xff]   ;;  %v2652_v51 = vld [vmem:[%s3636_s1 + $0x68] ss:$16 sps:$4 sm:$0xff]  }
  0x15   :  { %v2659_v52 = vld [vmem:[%s3636_s1 + $0x84] ss:$16 sps:$4 sm:$0xff]   ;;  %v2664_v53 = vld [vmem:[%s3636_s1 + $0x8c] ss:$16 sps:$4 sm:$0xff]   ;;  %v2671_v54 = vld [vmem:[%s3636_s1 + $0x80] ss:$16 sps:$4 sm:$0xff]  }
  0x16   :  { %v99_v40 = vld [vmem:[#allocation2] sm:$0xf]  ;;  %v2676_v55 = vld [vmem:[%s3636_s1 + $0x88] ss:$16 sps:$4 sm:$0xff]   ;;  %v2683_v56 = vld [vmem:[%s3636_s1 + $0xa4] ss:$16 sps:$4 sm:$0xff]  }
  0x17   :  { %271 = vmatpush1.bf16.msra.mxu0 %v2496_v23  ;;  %312 = vmatpush1.bf16.msra.mxu1 %v2503_v24  ;;  %v2688_v57 = vld [vmem:[%s3636_s1 + $0xac] ss:$16 sps:$4 sm:$0xff]   ;;  %v2695_v58 = vld [vmem:[%s3636_s1 + $0xa0] ss:$16 sps:$4 sm:$0xff]   ;;  %v2700_v59 = vld [vmem:[%s3636_s1 + $0xa8] ss:$16 sps:$4 sm:$0xff]  }
  0x18   :  { %272 = vmatprep.subr.bf16.mxu0 %v2508_v25  ;;  %313 = vmatprep.subr.bf16.mxu1 %v2515_v26  ;;  %v2707_v60 = vld [vmem:[%s3636_s1 + $0xc4] ss:$16 sps:$4 sm:$0xff]   ;;  %v2712_v61 = vld [vmem:[%s3636_s1 + $0xcc] ss:$16 sps:$4 sm:$0xff]   ;;  %v2719_v62 = vld [vmem:[%s3636_s1 + $0xc0] ss:$16 sps:$4 sm:$0xff]  }
  0x19   :  { %v2724_v63 = vld [vmem:[%s3636_s1 + $0xc8] ss:$16 sps:$4 sm:$0xff]   ;;  %v2731_v29 = vld [vmem:[%s3636_s1 + $0xe4] ss:$16 sps:$4 sm:$0xff]   ;;  %v2736_v31 = vld [vmem:[%s3636_s1 + $0xec] ss:$16 sps:$4 sm:$0xff]  }
  0x1a   :  { %3728 = vst [vmem:[#allocation23_spill] sm:$0xff] %v2724_v63 }
  0x1b   :  { %273 = vmatpush1.bf16.msra.mxu0 %v2520_v27  ;;  %314 = vmatpush1.bf16.msra.mxu1 %v2525_v28 }
  0x1c   :  { %274 = vmatprep.subr.bf16.mxu0 %v2535_v30  ;;  %315 = vmatprep.subr.bf16.mxu1 %v2542_v32 }
  0x1f   :  { %275 = vmatpush1.bf16.msra.mxu0 %v2547_v33  ;;  %316 = vmatpush1.bf16.msra.mxu1 %v2554_v34 }
  0x20   :  { %502 = vmatprep.subr.bf16.mxu0 %v2561_v35  ;;  %543 = vmatprep.subr.bf16.mxu1 %v2566_v36 }
  0x22   :  { %293 = vmatmul.mubr.bf16.vlgmr.msra.gmra.mrb[0].mxu0 %v99_v40  ;;  %334 = vmatmul.mubr.bf16.vlgmr.msra.gmra.mrb[0].mxu1 %v99_v40  ;;  %v2743_v40 = vld [vmem:[%s3636_s1 + $0xe0] ss:$16 sps:$4 sm:$0xff]  }
  0x23   :  { %503 = vmatpush1.bf16.msra.mxu0 %v2571_v37  ;;  %544 = vmatpush1.bf16.msra.mxu1 %v2576_v38  ;;  %3729 = vst [vmem:[#allocation24_spill] sm:$0xff] %v2743_v40 }
  0x24   :  { %504 = vmatprep.subr.bf16.mxu0 %v2583_v39  ;;  %545 = vmatprep.subr.bf16.mxu1 %v2590_v41 }
  0x25   :  { %534 = vmatprep.mubr.bf16.mxu0 %v3643_v1  ;;  %575 = vmatprep.mubr.bf16.mxu1 %v3643_v1  ;;  %v2748_v1 = vld [vmem:[%s3636_s1 + $0xe8] ss:$16 sps:$4 sm:$0xff]  }
  0x27   :  { %505 = vmatpush1.bf16.msra.mxu0 %v2595_v42  ;;  %546 = vmatpush1.bf16.msra.mxu1 %v2602_v43 }
  0x28   :  { %506 = vmatprep.subr.bf16.mxu0 %v2609_v44  ;;  %547 = vmatprep.subr.bf16.mxu1 %v2614_v45 }
  0x2b   :  { %507 = vmatpush1.bf16.msra.mxu0 %v2621_v46  ;;  %548 = vmatpush1.bf16.msra.mxu1 %v2628_v47 }
  0x2c   :  { %508 = vmatprep.subr.bf16.mxu0 %v2633_v48  ;;  %549 = vmatprep.subr.bf16.mxu1 %v2640_v49 }
  0x2f   :  { %509 = vmatpush1.bf16.msra.mxu0 %v2647_v50  ;;  %550 = vmatpush1.bf16.msra.mxu1 %v2652_v51 }
  0x30   :  { %510 = vmatprep.subr.bf16.mxu0 %v2659_v52  ;;  %551 = vmatprep.subr.bf16.mxu1 %v2664_v53 }
  0x33   :  { %511 = vmatpush1.bf16.msra.mxu0 %v2671_v54  ;;  %552 = vmatpush1.bf16.msra.mxu1 %v2676_v55 }
  0x34   :  { %512 = vmatprep.subr.bf16.mxu0 %v2683_v56  ;;  %553 = vmatprep.subr.bf16.mxu1 %v2688_v57 }
  0x37   :  { %513 = vmatpush1.bf16.msra.mxu0 %v2695_v58  ;;  %554 = vmatpush1.bf16.msra.mxu1 %v2700_v59 }
  0x38   :  { %514 = vmatprep.subr.bf16.mxu0 %v2707_v60  ;;  %555 = vmatprep.subr.bf16.mxu1 %v2712_v61 }
  0x3b   :  { %515 = vmatpush1.bf16.msra.mxu0 %v2719_v62  ;;  %556 = vmatpush1.bf16.msra.mxu1 %v2724_v63  ;;  %v98_v63 = vld [vmem:[%s3638_s0] sm:$0xf] }
  0x3c   :  { %516 = vmatprep.subr.bf16.mxu0 %v2731_v29  ;;  %557 = vmatprep.subr.bf16.mxu1 %v2736_v31 }
  0x3f   :  { %517 = vmatpush1.bf16.msra.mxu0 %v2743_v40  ;;  %558 = vmatpush1.bf16.msra.mxu1 %v2748_v1  ;;  %v3730_v40 = vmov 0  }
  0x40   :  { %607 = vmatprep.subr.bf16.mxu0 %v2366_v0  ;;  %648 = vmatprep.subr.bf16.mxu1 %v2373_v2 }
  0x42   :  { %535 = vmatmul.mubr.bf16.vlgmr.msra.gmra.mrb[0].mxu0 %v98_v63  ;;  %576 = vmatmul.mubr.bf16.vlgmr.msra.gmra.mrb[0].mxu1 %v98_v63 }
  0x43   :  { %608 = vmatpush1.bf16.msra.mxu0 %v2379_v3  ;;  %649 = vmatpush1.bf16.msra.mxu1 %v2384_v4 }
  0x44   :  { %609 = vmatprep.subr.bf16.mxu0 %v2390_v5  ;;  %650 = vmatprep.subr.bf16.mxu1 %v2397_v6 }
  0x45   :  { %639 = vmatprep.mubr.bf16.mxu0 %v3730_v40  ;;  %680 = vmatprep.mubr.bf16.mxu1 %v3730_v40 }
  0x47   :  { %610 = vmatpush1.bf16.msra.mxu0 %v2402_v7  ;;  %651 = vmatpush1.bf16.msra.mxu1 %v2408_v8 }
  0x48   :  { %611 = vmatprep.subr.bf16.mxu0 %v2414_v9  ;;  %652 = vmatprep.subr.bf16.mxu1 %v2419_v10 }
  0x4b   :  { %612 = vmatpush1.bf16.msra.mxu0 %v2424_v11  ;;  %653 = vmatpush1.bf16.msra.mxu1 %v2429_v12 }
  0x4c   :  { %613 = vmatprep.subr.bf16.mxu0 %v2436_v13  ;;  %654 = vmatprep.subr.bf16.mxu1 %v2443_v14 }
  0x4f   :  { %614 = vmatpush1.bf16.msra.mxu0 %v2448_v15  ;;  %655 = vmatpush1.bf16.msra.mxu1 %v2455_v16 }
  0x50   :  { %615 = vmatprep.subr.bf16.mxu0 %v2460_v17  ;;  %656 = vmatprep.subr.bf16.mxu1 %v2467_v18 }
  0x53   :  { %616 = vmatpush1.bf16.msra.mxu0 %v2472_v19  ;;  %657 = vmatpush1.bf16.msra.mxu1 %v2477_v20 }
  0x54   :  { %617 = vmatprep.subr.bf16.mxu0 %v2484_v21  ;;  %658 = vmatprep.subr.bf16.mxu1 %v2491_v22 }
  0x57   :  { %618 = vmatpush1.bf16.msra.mxu0 %v2496_v23  ;;  %659 = vmatpush1.bf16.msra.mxu1 %v2503_v24 }
  0x58   :  { %619 = vmatprep.subr.bf16.mxu0 %v2508_v25  ;;  %660 = vmatprep.subr.bf16.mxu1 %v2515_v26 }
  0x5b   :  { %620 = vmatpush1.bf16.msra.mxu0 %v2520_v27  ;;  %661 = vmatpush1.bf16.msra.mxu1 %v2525_v28 }
  0x5c   :  { %621 = vmatprep.subr.bf16.mxu0 %v2535_v30  ;;  %662 = vmatprep.subr.bf16.mxu1 %v2542_v32 }
  0x5f   :  { %622 = vmatpush1.bf16.msra.mxu0 %v2547_v33  ;;  %663 = vmatpush1.bf16.msra.mxu1 %v2554_v34 }
  0x60   :  { %689 = vmatprep.subr.bf16.mxu0 %v2561_v35  ;;  %730 = vmatprep.subr.bf16.mxu1 %v2566_v36  ;;  %v31_v36 = vld [vmem:[%s3639_s4] sm:$0xff] }
 0x115   :  { %v536_v63 = vpop.f32.mrb[0].mxu0  ;;  %v577_v25 = vpop.f32.mrb[0].mxu1 }
 0x116   :  { %2178 = vtanh.f32 %v536_v63  ;;  %v538_v26 = vpop.f32.mrb[1].mxu0  ;;  %v579_v24 = vpop.f32.mrb[1].mxu1 }
 0x117   :  { %v540_v27 = vpop.f32.mrb[2].mxu0  ;;  %v581_v23 = vpop.f32.mrb[2].mxu1  ;;  %2180 = vtanh.f32 %v538_v26 }
 0x118   :  { %v541_v28 = vpop.f32.mrb[3].mxu0  ;;  %v582_v30 = vpop.f32.mrb[3].mxu1  ;;  %2182 = vtanh.f32 %v577_v25 }
 0x119   :  { %2184 = vtanh.f32 %v579_v24 }
 0x120   :  { %v2179_v32 = vpop.eup %2178 }
 0x121   :  { %v585_v22 = vmul.f32 0.5, %v2179_v32  ;;  %v2181_v33 = vpop.eup %2180  ;;  %v3733_v32 = vld [vmem:[#allocation7_spill] sm:$0xff] }
 0x122   :  { %v588_v34 = vmul.f32 0.5, %v2181_v33  ;;  %v2183_v35 = vpop.eup %2182  ;;  %v3734_v33 = vld [vmem:[#allocation8_spill] sm:$0xff] }
 0x123   :  { %v586_v21 = vadd.f32 0.5, %v585_v22  ;;  %v2185_v23 = vpop.eup %2184 }
 0x124   :  { %v589_v63 = vadd.f32 0.5, %v588_v34  ;;  %v592_v25 = vmul.f32 0.5, %v2185_v23  ;;  %v3735_v34 = vld [vmem:[#allocation9_spill] sm:$0xff] }
 0x125   :  { %v595_v20 = vmul.f32 %v2183_v35, %v586_v21  ;;  %v2003_v21 = vld [vmem:[%s3638_s0 + $0x4] sm:$0xf]  ;;  %v3736_v35 = vld [vmem:[#allocation10_spill] sm:$0xff]  ;;  %v3739_v23 = vld [vmem:[#allocation13_spill] sm:$0xff] }
 0x126   :  { %v594_v19 = vmul.f32 %v589_v63, %v31_v36  ;;  %v593_v26 = vadd.f32 0.5, %v592_v25  ;;  %v3737_v36 = vld [vmem:[#allocation11_spill] sm:$0xff]  ;;  %v3738_v63 = vld [vmem:[#allocation12_spill] sm:$0xff]  ;;  %v3740_v25 = vld [vmem:[#allocation14_spill] sm:$0xff] }
 0x128   :  { %v2796_v27 = vadd.f32 %v595_v20, %v594_v19  ;;  %v3731_v19 = vld [vmem:[#allocation23_spill] sm:$0xff]  ;;  %v3732_v20 = vld [vmem:[#allocation24_spill] sm:$0xff] }
 0x12a   :  { %2186 = vtanh.f32 %v2796_v27 }
 0x134   :  { %v2187_v28 = vpop.eup %2186 }
 0x135   :  { %v598_v30 = vmul.f32 %v2187_v28, %v593_v26  ;;  %v3741_v26 = vld [vmem:[#allocation15_spill] sm:$0xff]  ;;  %v3742_v28 = vld [vmem:[#allocation16_spill] sm:$0xff] }
 0x137   :  { %v599_v22 = vpack.c.bf16 %v598_v30, %v598_v30  ;;  %602 = vst [vmem:[%s3640_s5] sm:$0xff] %v598_v30  ;;  %v3743_v30 = vld [vmem:[#allocation17_spill] sm:$0xff] }
 0x139   :  { %600 = vst [vmem:[#allocation2] sm:$0xf] %v599_v22  ;;  %v3744_v22 = vld [vmem:[#allocation18_spill] sm:$0xff] }
 0x140   :  { %v606_v24 = vld [vmem:[#allocation2] sm:$0xf] }
 0x141   :  { %640 = vmatmul.mubr.bf16.vlgmr.msra.gmra.mrb[4].mxu0 %v606_v24  ;;  %681 = vmatmul.mubr.bf16.vlgmr.msra.gmra.mrb[4].mxu1 %v606_v24  ;;  %v3745_v24 = vld [vmem:[#allocation19_spill] sm:$0xff] }
 0x142   :  { %690 = vmatpush1.bf16.msra.mxu0 %v2571_v37  ;;  %731 = vmatpush1.bf16.msra.mxu1 %v2576_v38 }
 0x143   :  { %691 = vmatprep.subr.bf16.mxu0 %v2583_v39  ;;  %732 = vmatprep.subr.bf16.mxu1 %v2590_v41 }
 0x144   :  { %721 = vmatprep.mubr.bf16.mxu0 %v3730_v40  ;;  %762 = vmatprep.mubr.bf16.mxu1 %v3730_v40 }
 0x146   :  { %692 = vmatpush1.bf16.msra.mxu0 %v2595_v42  ;;  %733 = vmatpush1.bf16.msra.mxu1 %v2602_v43 }
 0x147   :  { %693 = vmatprep.subr.bf16.mxu0 %v2609_v44  ;;  %734 = vmatprep.subr.bf16.mxu1 %v2614_v45 }
 0x14a   :  { %694 = vmatpush1.bf16.msra.mxu0 %v2621_v46  ;;  %735 = vmatpush1.bf16.msra.mxu1 %v2628_v47 }
 0x14b   :  { %695 = vmatprep.subr.bf16.mxu0 %v2633_v48  ;;  %736 = vmatprep.subr.bf16.mxu1 %v2640_v49 }
 0x14e   :  { %696 = vmatpush1.bf16.msra.mxu0 %v2647_v50  ;;  %737 = vmatpush1.bf16.msra.mxu1 %v2652_v51 }
 0x14f   :  { %697 = vmatprep.subr.bf16.mxu0 %v2659_v52  ;;  %738 = vmatprep.subr.bf16.mxu1 %v2664_v53 }
 0x152   :  { %698 = vmatpush1.bf16.msra.mxu0 %v2671_v54  ;;  %739 = vmatpush1.bf16.msra.mxu1 %v2676_v55 }
 0x153   :  { %699 = vmatprep.subr.bf16.mxu0 %v2683_v56  ;;  %740 = vmatprep.subr.bf16.mxu1 %v2688_v57 }
 0x156   :  { %700 = vmatpush1.bf16.msra.mxu0 %v2695_v58  ;;  %741 = vmatpush1.bf16.msra.mxu1 %v2700_v59 }
 0x157   :  { %701 = vmatprep.subr.bf16.mxu0 %v2707_v60  ;;  %742 = vmatprep.subr.bf16.mxu1 %v2712_v61 }
 0x15a   :  { %702 = vmatpush1.bf16.msra.mxu0 %v2719_v62  ;;  %743 = vmatpush1.bf16.msra.mxu1 %v3731_v19 }
 0x15b   :  { %703 = vmatprep.subr.bf16.mxu0 %v2731_v29  ;;  %744 = vmatprep.subr.bf16.mxu1 %v2736_v31 }
 0x15e   :  { %704 = vmatpush1.bf16.msra.mxu0 %v3732_v20  ;;  %745 = vmatpush1.bf16.msra.mxu1 %v2748_v1 }
 0x15f   :  { %795 = vmatprep.subr.bf16.mxu0 %v2366_v0  ;;  %836 = vmatprep.subr.bf16.mxu1 %v2373_v2 }
 0x161   :  { %722 = vmatmul.mubr.bf16.vlgmr.msra.gmra.mrb[4].mxu0 %v2003_v21  ;;  %763 = vmatmul.mubr.bf16.vlgmr.msra.gmra.mrb[4].mxu1 %v2003_v21  ;;  %v3746_v21 = vld [vmem:[#allocation20_spill] sm:$0xff] }
 0x162   :  { %796 = vmatpush1.bf16.msra.mxu0 %v2379_v3  ;;  %837 = vmatpush1.bf16.msra.mxu1 %v2384_v4 }
 0x163   :  { %797 = vmatprep.subr.bf16.mxu0 %v2390_v5  ;;  %838 = vmatprep.subr.bf16.mxu1 %v2397_v6 }
 0x164   :  { %827 = vmatprep.mubr.bf16.mxu0 %v3730_v40  ;;  %868 = vmatprep.mubr.bf16.mxu1 %v3730_v40 }
 0x166   :  { %798 = vmatpush1.bf16.msra.mxu0 %v2402_v7  ;;  %839 = vmatpush1.bf16.msra.mxu1 %v2408_v8 }
 0x167   :  { %799 = vmatprep.subr.bf16.mxu0 %v2414_v9  ;;  %840 = vmatprep.subr.bf16.mxu1 %v2419_v10 }
 0x16a   :  { %800 = vmatpush1.bf16.msra.mxu0 %v2424_v11  ;;  %841 = vmatpush1.bf16.msra.mxu1 %v2429_v12 }
 0x16b   :  { %801 = vmatprep.subr.bf16.mxu0 %v2436_v13  ;;  %842 = vmatprep.subr.bf16.mxu1 %v2443_v14 }
 0x16e   :  { %802 = vmatpush1.bf16.msra.mxu0 %v2448_v15  ;;  %843 = vmatpush1.bf16.msra.mxu1 %v2455_v16 }
 0x16f   :  { %803 = vmatprep.subr.bf16.mxu0 %v2460_v17  ;;  %844 = vmatprep.subr.bf16.mxu1 %v2467_v18 }
 0x172   :  { %804 = vmatpush1.bf16.msra.mxu0 %v3733_v32  ;;  %845 = vmatpush1.bf16.msra.mxu1 %v3734_v33 }
 0x173   :  { %805 = vmatprep.subr.bf16.mxu0 %v3735_v34  ;;  %846 = vmatprep.subr.bf16.mxu1 %v3736_v35  ;;  %v3747_v35 = vld [vmem:[#allocation21_spill] sm:$0xff] }
 0x176   :  { %806 = vmatpush1.bf16.msra.mxu0 %v3737_v36  ;;  %847 = vmatpush1.bf16.msra.mxu1 %v3738_v63  ;;  %v3748_v36 = vld [vmem:[#allocation22_spill] sm:$0xff] }
 0x177   :  { %807 = vmatprep.subr.bf16.mxu0 %v3739_v23  ;;  %848 = vmatprep.subr.bf16.mxu1 %v3740_v25 }
 0x17a   :  { %808 = vmatpush1.bf16.msra.mxu0 %v3741_v26  ;;  %849 = vmatpush1.bf16.msra.mxu1 %v3742_v28 }
 0x17b   :  { %809 = vmatprep.subr.bf16.mxu0 %v3743_v30  ;;  %850 = vmatprep.subr.bf16.mxu1 %v3744_v22 }
 0x17e   :  { %810 = vmatpush1.bf16.msra.mxu0 %v3745_v24  ;;  %851 = vmatpush1.bf16.msra.mxu1 %v3746_v21 }
 0x17f   :  { %877 = vmatprep.subr.bf16.mxu0 %v3747_v35  ;;  %918 = vmatprep.subr.bf16.mxu1 %v3748_v36 }
 0x234   :  { %v723_v63 = vpop.f32.mrb[4].mxu0  ;;  %v764_v23 = vpop.f32.mrb[4].mxu1 }
 0x235   :  { %2188 = vtanh.f32 %v723_v63  ;;  %v725_v25 = vpop.f32.mrb[5].mxu0  ;;  %v766_v34 = vpop.f32.mrb[5].mxu1 }
 0x236   :  { %v727_v26 = vpop.f32.mrb[6].mxu0  ;;  %v768_v33 = vpop.f32.mrb[6].mxu1  ;;  %2190 = vtanh.f32 %v725_v25 }
 0x237   :  { %v728_v28 = vpop.f32.mrb[7].mxu0  ;;  %v769_v30 = vpop.f32.mrb[7].mxu1  ;;  %2192 = vtanh.f32 %v764_v23 }
 0x238   :  { %2194 = vtanh.f32 %v766_v34  ;;  %v3760_v34 = vld [vmem:[#allocation15_spill] sm:$0xff] }
 0x23f   :  { %v2189_v22 = vpop.eup %2188 }
 0x240   :  { %v772_v32 = vmul.f32 0.5, %v2189_v22  ;;  %v2191_v24 = vpop.eup %2190  ;;  %v3763_v22 = vld [vmem:[#allocation18_spill] sm:$0xff] }
 0x241   :  { %v775_v21 = vmul.f32 0.5, %v2191_v24  ;;  %v2193_v35 = vpop.eup %2192  ;;  %v3764_v24 = vld [vmem:[#allocation19_spill] sm:$0xff] }
 0x242   :  { %v773_v18 = vadd.f32 0.5, %v772_v32  ;;  %v2195_v33 = vpop.eup %2194 }
 0x243   :  { %v776_v17 = vadd.f32 0.5, %v775_v21  ;;  %v779_v25 = vmul.f32 0.5, %v2195_v33  ;;  %v3765_v21 = vld [vmem:[#allocation20_spill] sm:$0xff]  ;;  %v3766_v33 = vld [vmem:[#allocation21_spill] sm:$0xff] }
 0x244   :  { %v782_v36 = vmul.f32 %v2193_v35, %v773_v18  ;;  %v3758_v18 = vld [vmem:[#allocation13_spill] sm:$0xff]  ;;  %v3761_v35 = vld [vmem:[#allocation16_spill] sm:$0xff] }
 0x245   :  { %v781_v16 = vmul.f32 %v776_v17, %v2796_v27  ;;  %v780_v26 = vadd.f32 0.5, %v779_v25  ;;  %v3757_v17 = vld [vmem:[#allocation12_spill] sm:$0xff]  ;;  %v3759_v27 = vld [vmem:[#allocation14_spill] sm:$0xff] }
 0x246   :  { %v3767_v25 = vld [vmem:[#allocation22_spill] sm:$0xff] }
 0x247   :  { %v2874_v63 = vadd.f32 %v782_v36, %v781_v16  ;;  %v2005_v16 = vld [vmem:[%s3638_s0 + $0x8] sm:$0xf]  ;;  %v3762_v36 = vld [vmem:[#allocation17_spill] sm:$0xff] }
 0x249   :  { %2196 = vtanh.f32 %v2874_v63 }
 0x253   :  { %v2197_v28 = vpop.eup %2196 }
 0x254   :  { %v785_v23 = vmul.f32 %v2197_v28, %v780_v26 }
 0x256   :  { %v786_v30 = vpack.c.bf16 %v785_v23, %v785_v23  ;;  %2004 = vst [vmem:[%s3640_s5 + $0x8] sm:$0xff] %v785_v23 }
 0x258   :  { %787 = vst [vmem:[#allocation2] sm:$0xf] %v786_v30 }
 0x25f   :  { %v794_v32 = vld [vmem:[#allocation2] sm:$0xf] }
 0x260   :  { %828 = vmatmul.mubr.bf16.vlgmr.msra.gmra.mrb[8].mxu0 %v794_v32  ;;  %869 = vmatmul.mubr.bf16.vlgmr.msra.gmra.mrb[8].mxu1 %v794_v32 }
 0x261   :  { %878 = vmatpush1.bf16.msra.mxu0 %v2571_v37  ;;  %919 = vmatpush1.bf16.msra.mxu1 %v2576_v38 }
 0x262   :  { %879 = vmatprep.subr.bf16.mxu0 %v2583_v39  ;;  %920 = vmatprep.subr.bf16.mxu1 %v2590_v41 }
 0x263   :  { %909 = vmatprep.mubr.bf16.mxu0 %v3730_v40  ;;  %950 = vmatprep.mubr.bf16.mxu1 %v3730_v40 }
 0x265   :  { %880 = vmatpush1.bf16.msra.mxu0 %v2595_v42  ;;  %921 = vmatpush1.bf16.msra.mxu1 %v2602_v43 }
 0x266   :  { %881 = vmatprep.subr.bf16.mxu0 %v2609_v44  ;;  %922 = vmatprep.subr.bf16.mxu1 %v2614_v45 }
 0x269   :  { %882 = vmatpush1.bf16.msra.mxu0 %v2621_v46  ;;  %923 = vmatpush1.bf16.msra.mxu1 %v2628_v47 }
 0x26a   :  { %883 = vmatprep.subr.bf16.mxu0 %v2633_v48  ;;  %924 = vmatprep.subr.bf16.mxu1 %v2640_v49 }
 0x26d   :  { %884 = vmatpush1.bf16.msra.mxu0 %v2647_v50  ;;  %925 = vmatpush1.bf16.msra.mxu1 %v2652_v51 }
 0x26e   :  { %885 = vmatprep.subr.bf16.mxu0 %v2659_v52  ;;  %926 = vmatprep.subr.bf16.mxu1 %v2664_v53 }
 0x271   :  { %886 = vmatpush1.bf16.msra.mxu0 %v2671_v54  ;;  %927 = vmatpush1.bf16.msra.mxu1 %v2676_v55 }
 0x272   :  { %887 = vmatprep.subr.bf16.mxu0 %v2683_v56  ;;  %928 = vmatprep.subr.bf16.mxu1 %v2688_v57 }
 0x275   :  { %888 = vmatpush1.bf16.msra.mxu0 %v2695_v58  ;;  %929 = vmatpush1.bf16.msra.mxu1 %v2700_v59 }
 0x276   :  { %889 = vmatprep.subr.bf16.mxu0 %v2707_v60  ;;  %930 = vmatprep.subr.bf16.mxu1 %v2712_v61 }
 0x279   :  { %890 = vmatpush1.bf16.msra.mxu0 %v2719_v62  ;;  %931 = vmatpush1.bf16.msra.mxu1 %v3731_v19 }
 0x27a   :  { %891 = vmatprep.subr.bf16.mxu0 %v2731_v29  ;;  %932 = vmatprep.subr.bf16.mxu1 %v2736_v31 }
 0x27d   :  { %892 = vmatpush1.bf16.msra.mxu0 %v3732_v20  ;;  %933 = vmatpush1.bf16.msra.mxu1 %v2748_v1 }
 0x27e   :  { %983 = vmatprep.subr.bf16.mxu0 %v2366_v0  ;;  %1024 = vmatprep.subr.bf16.mxu1 %v2373_v2  ;;  %v3749_v0 = vld [vmem:[#allocation4_spill] sm:$0xff]  ;;  %v3750_v2 = vld [vmem:[#allocation5_spill] sm:$0xff] }
 0x280   :  { %910 = vmatmul.mubr.bf16.vlgmr.msra.gmra.mrb[8].mxu0 %v2005_v16  ;;  %951 = vmatmul.mubr.bf16.vlgmr.msra.gmra.mrb[8].mxu1 %v2005_v16 }
 0x281   :  { %984 = vmatpush1.bf16.msra.mxu0 %v2379_v3  ;;  %1025 = vmatpush1.bf16.msra.mxu1 %v2384_v4  ;;  %v3751_v3 = vld [vmem:[#allocation6_spill] sm:$0xff]  ;;  %v3752_v4 = vld [vmem:[#allocation7_spill] sm:$0xff] }
 0x282   :  { %985 = vmatprep.subr.bf16.mxu0 %v2390_v5  ;;  %1026 = vmatprep.subr.bf16.mxu1 %v2397_v6  ;;  %v3753_v5 = vld [vmem:[#allocation8_spill] sm:$0xff]  ;;  %v3754_v6 = vld [vmem:[#allocation9_spill] sm:$0xff] }
 0x283   :  { %1015 = vmatprep.mubr.bf16.mxu0 %v3730_v40  ;;  %1056 = vmatprep.mubr.bf16.mxu1 %v3730_v40 }
 0x285   :  { %986 = vmatpush1.bf16.msra.mxu0 %v2402_v7  ;;  %1027 = vmatpush1.bf16.msra.mxu1 %v2408_v8  ;;  %v3755_v7 = vld [vmem:[#allocation10_spill] sm:$0xff]  ;;  %v3756_v8 = vld [vmem:[#allocation11_spill] sm:$0xff] }
 0x286   :  { %987 = vmatprep.subr.bf16.mxu0 %v2414_v9  ;;  %1028 = vmatprep.subr.bf16.mxu1 %v2419_v10 }
 0x289   :  { %988 = vmatpush1.bf16.msra.mxu0 %v2424_v11  ;;  %1029 = vmatpush1.bf16.msra.mxu1 %v2429_v12 }
 0x28a   :  { %989 = vmatprep.subr.bf16.mxu0 %v2436_v13  ;;  %1030 = vmatprep.subr.bf16.mxu1 %v2443_v14 }
 0x28d   :  { %990 = vmatpush1.bf16.msra.mxu0 %v2448_v15  ;;  %1031 = vmatpush1.bf16.msra.mxu1 %v3749_v0 }
 0x28e   :  { %991 = vmatprep.subr.bf16.mxu0 %v3750_v2  ;;  %1032 = vmatprep.subr.bf16.mxu1 %v3751_v3 }
 0x291   :  { %992 = vmatpush1.bf16.msra.mxu0 %v3752_v4  ;;  %1033 = vmatpush1.bf16.msra.mxu1 %v3753_v5 }
 0x292   :  { %993 = vmatprep.subr.bf16.mxu0 %v3754_v6  ;;  %1034 = vmatprep.subr.bf16.mxu1 %v3755_v7 }
 0x295   :  { %994 = vmatpush1.bf16.msra.mxu0 %v3756_v8  ;;  %1035 = vmatpush1.bf16.msra.mxu1 %v3757_v17 }
 0x296   :  { %995 = vmatprep.subr.bf16.mxu0 %v3758_v18  ;;  %1036 = vmatprep.subr.bf16.mxu1 %v3759_v27 }
 0x299   :  { %996 = vmatpush1.bf16.msra.mxu0 %v3760_v34  ;;  %1037 = vmatpush1.bf16.msra.mxu1 %v3761_v35 }
 0x29a   :  { %997 = vmatprep.subr.bf16.mxu0 %v3762_v36  ;;  %1038 = vmatprep.subr.bf16.mxu1 %v3763_v22 }
 0x29d   :  { %998 = vmatpush1.bf16.msra.mxu0 %v3764_v24  ;;  %1039 = vmatpush1.bf16.msra.mxu1 %v3765_v21 }
 0x29e   :  { %1065 = vmatprep.subr.bf16.mxu0 %v3766_v33  ;;  %1106 = vmatprep.subr.bf16.mxu1 %v3767_v25 }
 0x353   :  { %v911_v26 = vpop.f32.mrb[8].mxu0  ;;  %v952_v28 = vpop.f32.mrb[8].mxu1 }
 0x354   :  { %2198 = vtanh.f32 %v911_v26  ;;  %v913_v23 = vpop.f32.mrb[9].mxu0  ;;  %v954_v30 = vpop.f32.mrb[9].mxu1 }
 0x355   :  { %v915_v32 = vpop.f32.mrb[10].mxu0  ;;  %v956_v16 = vpop.f32.mrb[10].mxu1  ;;  %2200 = vtanh.f32 %v913_v23 }
 0x356   :  { %v916_v35 = vpop.f32.mrb[11].mxu0  ;;  %v957_v36 = vpop.f32.mrb[11].mxu1  ;;  %2202 = vtanh.f32 %v952_v28 }
 0x357   :  { %2204 = vtanh.f32 %v954_v30 }
 0x35e   :  { %v2199_v22 = vpop.eup %2198 }
 0x35f   :  { %v960_v34 = vmul.f32 0.5, %v2199_v22  ;;  %v2201_v24 = vpop.eup %2200  ;;  %v3014_v22 = vld [vmem:[%s3635_s2 + $0x8] ss:$16 sps:$4 sm:$0xff]  }
 0x360   :  { %v963_v21 = vmul.f32 0.5, %v2201_v24  ;;  %v2203_v33 = vpop.eup %2202  ;;  %v3020_v24 = vld [vmem:[%s3635_s2 + $0x24] ss:$16 sps:$4 sm:$0xff]  }
 0x361   :  { %v961_v27 = vadd.f32 0.5, %v960_v34  ;;  %v2205_v32 = vpop.eup %2204 }
 0x362   :  { %v964_v18 = vadd.f32 0.5, %v963_v21  ;;  %v967_v23 = vmul.f32 0.5, %v2205_v32  ;;  %v3026_v21 = vld [vmem:[%s3635_s2 + $0x2c] ss:$16 sps:$4 sm:$0xff]  }
 0x363   :  { %v970_v25 = vmul.f32 %v2203_v33, %v961_v27  ;;  %v3008_v27 = vld [vmem:[%s3635_s2] ss:$16 sps:$4 sm:$0xff]  }
 0x364   :  { %v969_v17 = vmul.f32 %v964_v18, %v2874_v63  ;;  %v968_v35 = vadd.f32 0.5, %v967_v23  ;;  %v2007_v63 = vld [vmem:[%s3638_s0 + $0xc] sm:$0xf]  ;;  %v3034_v33 = vld [vmem:[%s3635_s2 + $0x20] ss:$16 sps:$4 sm:$0xff]  }
 0x365   :  { %v3002_v18 = vld [vmem:[%s3635_s2 + $0xc] ss:$16 sps:$4 sm:$0xff]  }
 0x366   :  { %v2952_v26 = vadd.f32 %v970_v25, %v969_v17  ;;  %v2996_v17 = vld [vmem:[%s3635_s2 + $0x4] ss:$16 sps:$4 sm:$0xff]   ;;  %v3040_v25 = vld [vmem:[%s3635_s2 + $0x28] ss:$16 sps:$4 sm:$0xff]  }
 0x368   :  { %2206 = vtanh.f32 %v2952_v26 }
 0x372   :  { %v2207_v36 = vpop.eup %2206 }
 0x373   :  { %v973_v28 = vmul.f32 %v2207_v36, %v968_v35 }
 0x375   :  { %v974_v16 = vpack.c.bf16 %v973_v28, %v973_v28  ;;  %2006 = vst [vmem:[%s3640_s5 + $0x10] sm:$0xff] %v973_v28 }
 0x377   :  { %975 = vst [vmem:[#allocation2] sm:$0xf] %v974_v16 }
 0x37e   :  { %v982_v34 = vld [vmem:[#allocation2] sm:$0xf] }
 0x37f   :  { %1016 = vmatmul.mubr.bf16.vlgmr.msra.gmra.mrb[12].mxu0 %v982_v34  ;;  %1057 = vmatmul.mubr.bf16.vlgmr.msra.gmra.mrb[12].mxu1 %v982_v34 }
 0x380   :  { %1066 = vmatpush1.bf16.msra.mxu0 %v2571_v37  ;;  %1107 = vmatpush1.bf16.msra.mxu1 %v2576_v38 }
 0x381   :  { %1067 = vmatprep.subr.bf16.mxu0 %v2583_v39  ;;  %1108 = vmatprep.subr.bf16.mxu1 %v2590_v41 }
 0x382   :  { %1097 = vmatprep.mubr.bf16.mxu0 %v3730_v40  ;;  %1138 = vmatprep.mubr.bf16.mxu1 %v3730_v40 }
 0x384   :  { %1068 = vmatpush1.bf16.msra.mxu0 %v2595_v42  ;;  %1109 = vmatpush1.bf16.msra.mxu1 %v2602_v43 }
 0x385   :  { %1069 = vmatprep.subr.bf16.mxu0 %v2609_v44  ;;  %1110 = vmatprep.subr.bf16.mxu1 %v2614_v45 }
 0x388   :  { %1070 = vmatpush1.bf16.msra.mxu0 %v2621_v46  ;;  %1111 = vmatpush1.bf16.msra.mxu1 %v2628_v47 }
 0x389   :  { %1071 = vmatprep.subr.bf16.mxu0 %v2633_v48  ;;  %1112 = vmatprep.subr.bf16.mxu1 %v2640_v49 }
 0x38c   :  { %1072 = vmatpush1.bf16.msra.mxu0 %v2647_v50  ;;  %1113 = vmatpush1.bf16.msra.mxu1 %v2652_v51 }
 0x38d   :  { %1073 = vmatprep.subr.bf16.mxu0 %v2659_v52  ;;  %1114 = vmatprep.subr.bf16.mxu1 %v2664_v53 }
 0x390   :  { %1074 = vmatpush1.bf16.msra.mxu0 %v2671_v54  ;;  %1115 = vmatpush1.bf16.msra.mxu1 %v2676_v55 }
 0x391   :  { %1075 = vmatprep.subr.bf16.mxu0 %v2683_v56  ;;  %1116 = vmatprep.subr.bf16.mxu1 %v2688_v57 }
 0x394   :  { %1076 = vmatpush1.bf16.msra.mxu0 %v2695_v58  ;;  %1117 = vmatpush1.bf16.msra.mxu1 %v2700_v59 }
 0x395   :  { %1077 = vmatprep.subr.bf16.mxu0 %v2707_v60  ;;  %1118 = vmatprep.subr.bf16.mxu1 %v2712_v61 }
 0x398   :  { %1078 = vmatpush1.bf16.msra.mxu0 %v2719_v62  ;;  %1119 = vmatpush1.bf16.msra.mxu1 %v3731_v19 }
 0x399   :  { %1079 = vmatprep.subr.bf16.mxu0 %v2731_v29  ;;  %1120 = vmatprep.subr.bf16.mxu1 %v2736_v31 }
 0x39c   :  { %1080 = vmatpush1.bf16.msra.mxu0 %v3732_v20  ;;  %1121 = vmatpush1.bf16.msra.mxu1 %v2748_v1 }
 0x39d   :  { %1171 = vmatprep.subr.bf16.mxu0 %v2996_v17  ;;  %1212 = vmatprep.subr.bf16.mxu1 %v3002_v18 }
 0x39f   :  { %1098 = vmatmul.mubr.bf16.vlgmr.msra.gmra.mrb[12].mxu0 %v2007_v63  ;;  %1139 = vmatmul.mubr.bf16.vlgmr.msra.gmra.mrb[12].mxu1 %v2007_v63 }
 0x3a0   :  { %1172 = vmatpush1.bf16.msra.mxu0 %v3008_v27  ;;  %1213 = vmatpush1.bf16.msra.mxu1 %v3014_v22 }
 0x3a1   :  { %1173 = vmatprep.subr.bf16.mxu0 %v3020_v24  ;;  %1214 = vmatprep.subr.bf16.mxu1 %v3026_v21 }
 0x3a2   :  { %1203 = vmatprep.mubr.bf16.mxu0 %v3730_v40  ;;  %1244 = vmatprep.mubr.bf16.mxu1 %v3730_v40 }
 0x3a4   :  { %1174 = vmatpush1.bf16.msra.mxu0 %v3034_v33  ;;  %1215 = vmatpush1.bf16.msra.mxu1 %v3040_v25 }
 0x3a5   :  { %1175 = vmatprep.subr.bf16.mxu0 %v2414_v9  ;;  %1216 = vmatprep.subr.bf16.mxu1 %v2419_v10  ;;  %v3768_v9 = vld [vmem:[#allocation12_spill] sm:$0xff]  ;;  %v3769_v10 = vld [vmem:[#allocation13_spill] sm:$0xff] }
 0x3a8   :  { %1176 = vmatpush1.bf16.msra.mxu0 %v2424_v11  ;;  %1217 = vmatpush1.bf16.msra.mxu1 %v2429_v12  ;;  %v3770_v11 = vld [vmem:[#allocation14_spill] sm:$0xff]  ;;  %v3771_v12 = vld [vmem:[#allocation15_spill] sm:$0xff] }
 0x3a9   :  { %1177 = vmatprep.subr.bf16.mxu0 %v2436_v13  ;;  %1218 = vmatprep.subr.bf16.mxu1 %v2443_v14  ;;  %v3772_v13 = vld [vmem:[#allocation16_spill] sm:$0xff]  ;;  %v3773_v14 = vld [vmem:[#allocation17_spill] sm:$0xff] }
 0x3ac   :  { %1178 = vmatpush1.bf16.msra.mxu0 %v2448_v15  ;;  %1219 = vmatpush1.bf16.msra.mxu1 %v3749_v0  ;;  %v3774_v15 = vld [vmem:[#allocation18_spill] sm:$0xff]  ;;  %v3775_v0 = vld [vmem:[#allocation19_spill] sm:$0xff] }
 0x3ad   :  { %1179 = vmatprep.subr.bf16.mxu0 %v3750_v2  ;;  %1220 = vmatprep.subr.bf16.mxu1 %v3751_v3  ;;  %v3776_v2 = vld [vmem:[#allocation20_spill] sm:$0xff]  ;;  %v3777_v3 = vld [vmem:[#allocation21_spill] sm:$0xff] }
 0x3b0   :  { %1180 = vmatpush1.bf16.msra.mxu0 %v3752_v4  ;;  %1221 = vmatpush1.bf16.msra.mxu1 %v3753_v5  ;;  %v3778_v4 = vld [vmem:[#allocation22_spill] sm:$0xff] }
 0x3b1   :  { %1181 = vmatprep.subr.bf16.mxu0 %v3754_v6  ;;  %1222 = vmatprep.subr.bf16.mxu1 %v3755_v7 }
 0x3b4   :  { %1182 = vmatpush1.bf16.msra.mxu0 %v3756_v8  ;;  %1223 = vmatpush1.bf16.msra.mxu1 %v3768_v9 }
 0x3b5   :  { %1183 = vmatprep.subr.bf16.mxu0 %v3769_v10  ;;  %1224 = vmatprep.subr.bf16.mxu1 %v3770_v11 }
 0x3b8   :  { %1184 = vmatpush1.bf16.msra.mxu0 %v3771_v12  ;;  %1225 = vmatpush1.bf16.msra.mxu1 %v3772_v13 }
 0x3b9   :  { %1185 = vmatprep.subr.bf16.mxu0 %v3773_v14  ;;  %1226 = vmatprep.subr.bf16.mxu1 %v3774_v15 }
 0x3bc   :  { %1186 = vmatpush1.bf16.msra.mxu0 %v3775_v0  ;;  %1227 = vmatpush1.bf16.msra.mxu1 %v3776_v2 }
 0x3bd   :  { %1253 = vmatprep.subr.bf16.mxu0 %v3777_v3  ;;  %1294 = vmatprep.subr.bf16.mxu1 %v3778_v4 }
 0x472   :  { %v1099_v5 = vpop.f32.mrb[12].mxu0  ;;  %v1140_v6 = vpop.f32.mrb[12].mxu1 }
 0x473   :  { %2208 = vtanh.f32 %v1099_v5  ;;  %v1101_v7 = vpop.f32.mrb[13].mxu0  ;;  %v1142_v8 = vpop.f32.mrb[13].mxu1 }
 0x474   :  { %v1103_v30 = vpop.f32.mrb[14].mxu0  ;;  %v1144_v32 = vpop.f32.mrb[14].mxu1  ;;  %2210 = vtanh.f32 %v1101_v7 }
 0x475   :  { %v1104_v23 = vpop.f32.mrb[15].mxu0  ;;  %v1145_v35 = vpop.f32.mrb[15].mxu1  ;;  %2212 = vtanh.f32 %v1140_v6 }
 0x476   :  { %2214 = vtanh.f32 %v1142_v8 }
 0x47d   :  { %v2209_v36 = vpop.eup %2208 }
 0x47e   :  { %v1148_v28 = vmul.f32 0.5, %v2209_v36  ;;  %v2211_v16 = vpop.eup %2210 }
 0x47f   :  { %v1151_v63 = vmul.f32 0.5, %v2211_v16  ;;  %v2213_v9 = vpop.eup %2212 }
 0x480   :  { %v1149_v34 = vadd.f32 0.5, %v1148_v28  ;;  %v2215_v14 = vpop.eup %2214 }
 0x481   :  { %v1152_v10 = vadd.f32 0.5, %v1151_v63  ;;  %v1155_v15 = vmul.f32 0.5, %v2215_v14 }
 0x482   :  { %v1158_v11 = vmul.f32 %v2213_v9, %v1149_v34 }
 0x483   :  { %v1157_v12 = vmul.f32 %v1152_v10, %v2952_v26  ;;  %v1156_v0 = vadd.f32 0.5, %v1155_v15 }
 0x485   :  { %v3070_v13 = vadd.f32 %v1158_v11, %v1157_v12 }
 0x487   :  { %2216 = vtanh.f32 %v3070_v13 }
 0x491   :  { %v2217_v2 = vpop.eup %2216 }
 0x492   :  { %v1161_v3 = vmul.f32 %v2217_v2, %v1156_v0 }
 0x494   :  { %v1162_v4 = vpack.c.bf16 %v1161_v3, %v1161_v3  ;;  %2008 = vst [vmem:[%s3640_s5 + $0x18] sm:$0xff] %v1161_v3 }
 0x496   :  { %1163 = vst [vmem:[#allocation2] sm:$0xf] %v1162_v4  ;;  %v3293_v4 = vld [vmem:[%s3636_s1 + $0x8] ss:$16 sps:$4 sm:$0xff]  }
 0x49d   :  { %v1170_v5 = vld [vmem:[#allocation2] sm:$0xf] }
 0x49e   :  { %1204 = vmatmul.mubr.bf16.vlgmr.msra.gmra.mrb[16].mxu0 %v1170_v5  ;;  %1245 = vmatmul.mubr.bf16.vlgmr.msra.gmra.mrb[16].mxu1 %v1170_v5  ;;  %v3299_v5 = vld [vmem:[%s3636_s1 + $0x24] ss:$16 sps:$4 sm:$0xff]  }
 0x49f   :  { %1254 = vmatpush1.bf16.msra.mxu0 %v2571_v37  ;;  %1295 = vmatpush1.bf16.msra.mxu1 %v2576_v38  ;;  %v2009_v37 = vld [vmem:[%s3638_s0 + $0x10] sm:$0xf]  ;;  %v3130_v38 = vld [vmem:[%s3635_s2 + $0x4c] ss:$16 sps:$4 sm:$0xff]  }
 0x4a0   :  { %1255 = vmatprep.subr.bf16.mxu0 %v2583_v39  ;;  %1296 = vmatprep.subr.bf16.mxu1 %v2590_v41  ;;  %v3136_v39 = vld [vmem:[%s3635_s2 + $0x40] ss:$16 sps:$4 sm:$0xff]   ;;  %v3142_v41 = vld [vmem:[%s3635_s2 + $0x48] ss:$16 sps:$4 sm:$0xff]  }
 0x4a1   :  { %1285 = vmatprep.mubr.bf16.mxu0 %v3730_v40  ;;  %1326 = vmatprep.mubr.bf16.mxu1 %v3730_v40 }
 0x4a3   :  { %1256 = vmatpush1.bf16.msra.mxu0 %v2595_v42  ;;  %1297 = vmatpush1.bf16.msra.mxu1 %v2602_v43  ;;  %v3148_v42 = vld [vmem:[%s3635_s2 + $0x64] ss:$16 sps:$4 sm:$0xff]   ;;  %v3154_v43 = vld [vmem:[%s3635_s2 + $0x6c] ss:$16 sps:$4 sm:$0xff]  }
 0x4a4   :  { %1257 = vmatprep.subr.bf16.mxu0 %v2609_v44  ;;  %1298 = vmatprep.subr.bf16.mxu1 %v2614_v45  ;;  %v3160_v44 = vld [vmem:[%s3635_s2 + $0x60] ss:$16 sps:$4 sm:$0xff]   ;;  %v3166_v45 = vld [vmem:[%s3635_s2 + $0x68] ss:$16 sps:$4 sm:$0xff]  }
 0x4a7   :  { %1258 = vmatpush1.bf16.msra.mxu0 %v2621_v46  ;;  %1299 = vmatpush1.bf16.msra.mxu1 %v2628_v47  ;;  %v3172_v46 = vld [vmem:[%s3635_s2 + $0x84] ss:$16 sps:$4 sm:$0xff]   ;;  %v3178_v47 = vld [vmem:[%s3635_s2 + $0x8c] ss:$16 sps:$4 sm:$0xff]  }
 0x4a8   :  { %1259 = vmatprep.subr.bf16.mxu0 %v2633_v48  ;;  %1300 = vmatprep.subr.bf16.mxu1 %v2640_v49  ;;  %v3184_v48 = vld [vmem:[%s3635_s2 + $0x80] ss:$16 sps:$4 sm:$0xff]   ;;  %v3190_v49 = vld [vmem:[%s3635_s2 + $0x88] ss:$16 sps:$4 sm:$0xff]  }
 0x4a9   :  { %3779 = vst [vmem:[#allocation23_spill] sm:$0xff] %v3184_v48  ;;  %3780 = vst [vmem:[#allocation24_spill] sm:$0xff] %v3190_v49 }
 0x4ab   :  { %1260 = vmatpush1.bf16.msra.mxu0 %v2647_v50  ;;  %1301 = vmatpush1.bf16.msra.mxu1 %v2652_v51  ;;  %v3196_v50 = vld [vmem:[%s3635_s2 + $0xa4] ss:$16 sps:$4 sm:$0xff]   ;;  %v3202_v51 = vld [vmem:[%s3635_s2 + $0xac] ss:$16 sps:$4 sm:$0xff]  }
 0x4ac   :  { %1261 = vmatprep.subr.bf16.mxu0 %v2659_v52  ;;  %1302 = vmatprep.subr.bf16.mxu1 %v2664_v53  ;;  %3781 = vst [vmem:[#allocation4_spill] sm:$0xff] %v3196_v50  ;;  %3782 = vst [vmem:[#allocation5_spill] sm:$0xff] %v3202_v51  ;;  %v3208_v52 = vld [vmem:[%s3635_s2 + $0xa0] ss:$16 sps:$4 sm:$0xff]   ;;  %v3214_v53 = vld [vmem:[%s3635_s2 + $0xa8] ss:$16 sps:$4 sm:$0xff]  }
 0x4ad   :  { %3783 = vst [vmem:[#allocation6_spill] sm:$0xff] %v3208_v52  ;;  %3784 = vst [vmem:[#allocation7_spill] sm:$0xff] %v3214_v53 }
 0x4af   :  { %1262 = vmatpush1.bf16.msra.mxu0 %v2671_v54  ;;  %1303 = vmatpush1.bf16.msra.mxu1 %v2676_v55  ;;  %v3220_v54 = vld [vmem:[%s3635_s2 + $0xc4] ss:$16 sps:$4 sm:$0xff]   ;;  %v3226_v55 = vld [vmem:[%s3635_s2 + $0xcc] ss:$16 sps:$4 sm:$0xff]  }
 0x4b0   :  { %1263 = vmatprep.subr.bf16.mxu0 %v2683_v56  ;;  %1304 = vmatprep.subr.bf16.mxu1 %v2688_v57  ;;  %3785 = vst [vmem:[#allocation8_spill] sm:$0xff] %v3220_v54  ;;  %3786 = vst [vmem:[#allocation9_spill] sm:$0xff] %v3226_v55  ;;  %v3232_v56 = vld [vmem:[%s3635_s2 + $0xc0] ss:$16 sps:$4 sm:$0xff]   ;;  %v3238_v57 = vld [vmem:[%s3635_s2 + $0xc8] ss:$16 sps:$4 sm:$0xff]  }
 0x4b1   :  { %3787 = vst [vmem:[#allocation10_spill] sm:$0xff] %v3232_v56  ;;  %3788 = vst [vmem:[#allocation11_spill] sm:$0xff] %v3238_v57 }
 0x4b3   :  { %1264 = vmatpush1.bf16.msra.mxu0 %v2695_v58  ;;  %1305 = vmatpush1.bf16.msra.mxu1 %v2700_v59  ;;  %v3244_v58 = vld [vmem:[%s3635_s2 + $0xe4] ss:$16 sps:$4 sm:$0xff]   ;;  %v3250_v59 = vld [vmem:[%s3635_s2 + $0xec] ss:$16 sps:$4 sm:$0xff]  }
 0x4b4   :  { %1265 = vmatprep.subr.bf16.mxu0 %v2707_v60  ;;  %1306 = vmatprep.subr.bf16.mxu1 %v2712_v61  ;;  %3789 = vst [vmem:[#allocation12_spill] sm:$0xff] %v3244_v58  ;;  %3790 = vst [vmem:[#allocation13_spill] sm:$0xff] %v3250_v59  ;;  %v3256_v60 = vld [vmem:[%s3635_s2 + $0xe0] ss:$16 sps:$4 sm:$0xff]   ;;  %v3262_v61 = vld [vmem:[%s3635_s2 + $0xe8] ss:$16 sps:$4 sm:$0xff]  }
 0x4b5   :  { %3791 = vst [vmem:[#allocation14_spill] sm:$0xff] %v3256_v60  ;;  %3792 = vst [vmem:[#allocation15_spill] sm:$0xff] %v3262_v61 }
 0x4b7   :  { %1266 = vmatpush1.bf16.msra.mxu0 %v2719_v62  ;;  %1307 = vmatpush1.bf16.msra.mxu1 %v3731_v19  ;;  %v3268_v62 = vld [vmem:[%s3636_s1 + $0x4] ss:$16 sps:$4 sm:$0xff]  }
 0x4b8   :  { %1267 = vmatprep.subr.bf16.mxu0 %v2731_v29  ;;  %1308 = vmatprep.subr.bf16.mxu1 %v2736_v31  ;;  %3793 = vst [vmem:[#allocation16_spill] sm:$0xff] %v3268_v62  ;;  %v3274_v29 = vld [vmem:[%s3636_s1 + $0xc] ss:$16 sps:$4 sm:$0xff]  }
 0x4b9   :  { %3794 = vst [vmem:[#allocation17_spill] sm:$0xff] %v3274_v29 }
 0x4bb   :  { %1268 = vmatpush1.bf16.msra.mxu0 %v3732_v20  ;;  %1309 = vmatpush1.bf16.msra.mxu1 %v2748_v1  ;;  %v3124_v1 = vld [vmem:[%s3635_s2 + $0x44] ss:$16 sps:$4 sm:$0xff]  }
 0x4bc   :  { %1359 = vmatprep.subr.bf16.mxu0 %v2996_v17  ;;  %1400 = vmatprep.subr.bf16.mxu1 %v3002_v18 }
 0x4be   :  { %1286 = vmatmul.mubr.bf16.vlgmr.msra.gmra.mrb[16].mxu0 %v2009_v37  ;;  %1327 = vmatmul.mubr.bf16.vlgmr.msra.gmra.mrb[16].mxu1 %v2009_v37  ;;  %v3305_v37 = vld [vmem:[%s3636_s1 + $0x2c] ss:$16 sps:$4 sm:$0xff]  }
 0x4bf   :  { %1360 = vmatpush1.bf16.msra.mxu0 %v3008_v27  ;;  %1401 = vmatpush1.bf16.msra.mxu1 %v3014_v22 }
 0x4c0   :  { %1361 = vmatprep.subr.bf16.mxu0 %v3020_v24  ;;  %1402 = vmatprep.subr.bf16.mxu1 %v3026_v21 }
 0x4c1   :  { %1391 = vmatprep.mubr.bf16.mxu0 %v3730_v40  ;;  %1432 = vmatprep.mubr.bf16.mxu1 %v3730_v40 }
 0x4c3   :  { %1362 = vmatpush1.bf16.msra.mxu0 %v3034_v33  ;;  %1403 = vmatpush1.bf16.msra.mxu1 %v3040_v25 }
 0x4c4   :  { %1363 = vmatprep.subr.bf16.mxu0 %v3124_v1  ;;  %1404 = vmatprep.subr.bf16.mxu1 %v3130_v38 }
 0x4c7   :  { %1364 = vmatpush1.bf16.msra.mxu0 %v3136_v39  ;;  %1405 = vmatpush1.bf16.msra.mxu1 %v3142_v41 }
 0x4c8   :  { %1365 = vmatprep.subr.bf16.mxu0 %v3148_v42  ;;  %1406 = vmatprep.subr.bf16.mxu1 %v3154_v43 }
 0x4cb   :  { %1366 = vmatpush1.bf16.msra.mxu0 %v3160_v44  ;;  %1407 = vmatpush1.bf16.msra.mxu1 %v3166_v45 }
 0x4cc   :  { %1367 = vmatprep.subr.bf16.mxu0 %v3172_v46  ;;  %1408 = vmatprep.subr.bf16.mxu1 %v3178_v47 }
 0x4cf   :  { %1368 = vmatpush1.bf16.msra.mxu0 %v3184_v48  ;;  %1409 = vmatpush1.bf16.msra.mxu1 %v3190_v49 }
 0x4d0   :  { %1369 = vmatprep.subr.bf16.mxu0 %v3196_v50  ;;  %1410 = vmatprep.subr.bf16.mxu1 %v3202_v51 }
 0x4d3   :  { %1370 = vmatpush1.bf16.msra.mxu0 %v3208_v52  ;;  %1411 = vmatpush1.bf16.msra.mxu1 %v3214_v53 }
 0x4d4   :  { %1371 = vmatprep.subr.bf16.mxu0 %v3220_v54  ;;  %1412 = vmatprep.subr.bf16.mxu1 %v3226_v55 }
 0x4d7   :  { %1372 = vmatpush1.bf16.msra.mxu0 %v3232_v56  ;;  %1413 = vmatpush1.bf16.msra.mxu1 %v3238_v57 }
 0x4d8   :  { %1373 = vmatprep.subr.bf16.mxu0 %v3244_v58  ;;  %1414 = vmatprep.subr.bf16.mxu1 %v3250_v59 }
 0x4db   :  { %1374 = vmatpush1.bf16.msra.mxu0 %v3256_v60  ;;  %1415 = vmatpush1.bf16.msra.mxu1 %v3262_v61 }
 0x4dc   :  { %1441 = vmatprep.subr.bf16.mxu0 %v3268_v62  ;;  %1482 = vmatprep.subr.bf16.mxu1 %v3274_v29 }
 0x591   :  { %v1287_v31 = vpop.f32.mrb[16].mxu0  ;;  %v1328_v19 = vpop.f32.mrb[16].mxu1 }
 0x592   :  { %2218 = vtanh.f32 %v1287_v31  ;;  %v1289_v20 = vpop.f32.mrb[17].mxu0  ;;  %v1330_v26 = vpop.f32.mrb[17].mxu1  ;;  %v3313_v31 = vld [vmem:[%s3636_s1 + $0x20] ss:$16 sps:$4 sm:$0xff]  }
 0x593   :  { %v1291_v6 = vpop.f32.mrb[18].mxu0  ;;  %v1332_v7 = vpop.f32.mrb[18].mxu1  ;;  %2220 = vtanh.f32 %v1289_v20  ;;  %v3325_v20 = vld [vmem:[%s3636_s1 + $0x44] ss:$16 sps:$4 sm:$0xff]  }
 0x594   :  { %v1292_v8 = vpop.f32.mrb[19].mxu0  ;;  %v1333_v30 = vpop.f32.mrb[19].mxu1  ;;  %2222 = vtanh.f32 %v1328_v19  ;;  %v3319_v19 = vld [vmem:[%s3636_s1 + $0x28] ss:$16 sps:$4 sm:$0xff]   ;;  %v3337_v6 = vld [vmem:[%s3636_s1 + $0x40] ss:$16 sps:$4 sm:$0xff]  }
 0x595   :  { %2224 = vtanh.f32 %v1330_v26  ;;  %v3331_v26 = vld [vmem:[%s3636_s1 + $0x4c] ss:$16 sps:$4 sm:$0xff]   ;;  %v3343_v7 = vld [vmem:[%s3636_s1 + $0x48] ss:$16 sps:$4 sm:$0xff]   ;;  %v3349_v8 = vld [vmem:[%s3636_s1 + $0x64] ss:$16 sps:$4 sm:$0xff]  }
 0x596   :  { %v3355_v30 = vld [vmem:[%s3636_s1 + $0x6c] ss:$16 sps:$4 sm:$0xff]  }
 0x59c   :  { %v2219_v32 = vpop.eup %2218 }
 0x59d   :  { %v1336_v23 = vmul.f32 0.5, %v2219_v32  ;;  %v2221_v35 = vpop.eup %2220  ;;  %v3361_v32 = vld [vmem:[%s3636_s1 + $0x60] ss:$16 sps:$4 sm:$0xff]  }
 0x59e   :  { %v1339_v28 = vmul.f32 0.5, %v2221_v35  ;;  %v2223_v16 = vpop.eup %2222  ;;  %v3373_v35 = vld [vmem:[%s3636_s1 + $0x84] ss:$16 sps:$4 sm:$0xff]  }
 0x59f   :  { %v1337_v36 = vadd.f32 0.5, %v1336_v23  ;;  %v2225_v11 = vpop.eup %2224  ;;  %v3367_v23 = vld [vmem:[%s3636_s1 + $0x68] ss:$16 sps:$4 sm:$0xff]  }
 0x5a0   :  { %v1340_v34 = vadd.f32 0.5, %v1339_v28  ;;  %v1343_v12 = vmul.f32 0.5, %v2225_v11  ;;  %v3385_v28 = vld [vmem:[%s3636_s1 + $0x80] ss:$16 sps:$4 sm:$0xff]   ;;  %v3415_v11 = vld [vmem:[%s3636_s1 + $0xa8] ss:$16 sps:$4 sm:$0xff]  }
 0x5a1   :  { %v1346_v63 = vmul.f32 %v2223_v16, %v1337_v36  ;;  %v3379_v36 = vld [vmem:[%s3636_s1 + $0x8c] ss:$16 sps:$4 sm:$0xff]   ;;  %v3391_v16 = vld [vmem:[%s3636_s1 + $0x88] ss:$16 sps:$4 sm:$0xff]  }
 0x5a2   :  { %v1345_v9 = vmul.f32 %v1340_v34, %v3070_v13  ;;  %v1344_v14 = vadd.f32 0.5, %v1343_v12  ;;  %v3287_v13 = vld [vmem:[%s3636_s1] ss:$16 sps:$4 sm:$0xff]   ;;  %v3397_v34 = vld [vmem:[%s3636_s1 + $0xa4] ss:$16 sps:$4 sm:$0xff]  }
 0x5a3   :  { %v3421_v12 = vld [vmem:[%s3636_s1 + $0xc4] ss:$16 sps:$4 sm:$0xff]  }
 0x5a4   :  { %v3278_v10 = vadd.f32 %v1346_v63, %v1345_v9  ;;  %v3403_v63 = vld [vmem:[%s3636_s1 + $0xac] ss:$16 sps:$4 sm:$0xff]   ;;  %v3409_v9 = vld [vmem:[%s3636_s1 + $0xa0] ss:$16 sps:$4 sm:$0xff]  }
 0x5a6   :  { %2226 = vtanh.f32 %v3278_v10 }
 0x5b0   :  { %v2227_v15 = vpop.eup %2226 }
 0x5b1   :  { %v1349_v0 = vmul.f32 %v2227_v15, %v1344_v14  ;;  %v3427_v14 = vld [vmem:[%s3636_s1 + $0xcc] ss:$16 sps:$4 sm:$0xff]   ;;  %v3433_v15 = vld [vmem:[%s3636_s1 + $0xc0] ss:$16 sps:$4 sm:$0xff]  }
 0x5b2   :  { %3795 = vst [vmem:[#allocation18_spill] sm:$0xff] %v3433_v15 }
 0x5b3   :  { %v1350_v2 = vpack.c.bf16 %v1349_v0, %v1349_v0  ;;  %2010 = vst [vmem:[%s3640_s5 + $0x20] sm:$0xff] %v1349_v0  ;;  %v3439_v0 = vld [vmem:[%s3636_s1 + $0xc8] ss:$16 sps:$4 sm:$0xff]  }
 0x5b4   :  { %3796 = vst [vmem:[#allocation19_spill] sm:$0xff] %v3439_v0 }
 0x5b5   :  { %1351 = vst [vmem:[#allocation2] sm:$0xf] %v1350_v2  ;;  %v3445_v2 = vld [vmem:[%s3636_s1 + $0xe4] ss:$16 sps:$4 sm:$0xff]  }
 0x5b6   :  { %3797 = vst [vmem:[#allocation20_spill] sm:$0xff] %v3445_v2 }
 0x5bc   :  { %v1358_v3 = vld [vmem:[#allocation2] sm:$0xf] }
 0x5bd   :  { %1392 = vmatmul.mubr.bf16.vlgmr.msra.gmra.mrb[20].mxu0 %v1358_v3  ;;  %1433 = vmatmul.mubr.bf16.vlgmr.msra.gmra.mrb[20].mxu1 %v1358_v3  ;;  %v3451_v3 = vld [vmem:[%s3636_s1 + $0xec] ss:$16 sps:$4 sm:$0xff]  }
 0x5be   :  { %1442 = vmatpush1.bf16.msra.mxu0 %v3287_v13  ;;  %1483 = vmatpush1.bf16.msra.mxu1 %v3293_v4 }
 0x5bf   :  { %1443 = vmatprep.subr.bf16.mxu0 %v3299_v5  ;;  %1484 = vmatprep.subr.bf16.mxu1 %v3305_v37 }
 0x5c0   :  { %1473 = vmatprep.mubr.bf16.mxu0 %v3730_v40  ;;  %1514 = vmatprep.mubr.bf16.mxu1 %v3730_v40 }
 0x5c2   :  { %1444 = vmatpush1.bf16.msra.mxu0 %v3313_v31  ;;  %1485 = vmatpush1.bf16.msra.mxu1 %v3319_v19 }
 0x5c3   :  { %1445 = vmatprep.subr.bf16.mxu0 %v3325_v20  ;;  %1486 = vmatprep.subr.bf16.mxu1 %v3331_v26 }
 0x5c6   :  { %1446 = vmatpush1.bf16.msra.mxu0 %v3337_v6  ;;  %1487 = vmatpush1.bf16.msra.mxu1 %v3343_v7 }
 0x5c7   :  { %1447 = vmatprep.subr.bf16.mxu0 %v3349_v8  ;;  %1488 = vmatprep.subr.bf16.mxu1 %v3355_v30 }
 0x5ca   :  { %1448 = vmatpush1.bf16.msra.mxu0 %v3361_v32  ;;  %1489 = vmatpush1.bf16.msra.mxu1 %v3367_v23 }
 0x5cb   :  { %1449 = vmatprep.subr.bf16.mxu0 %v3373_v35  ;;  %1490 = vmatprep.subr.bf16.mxu1 %v3379_v36 }
 0x5ce   :  { %1450 = vmatpush1.bf16.msra.mxu0 %v3385_v28  ;;  %1491 = vmatpush1.bf16.msra.mxu1 %v3391_v16 }
 0x5cf   :  { %1451 = vmatprep.subr.bf16.mxu0 %v3397_v34  ;;  %1492 = vmatprep.subr.bf16.mxu1 %v3403_v63 }
 0x5d2   :  { %1452 = vmatpush1.bf16.msra.mxu0 %v3409_v9  ;;  %1493 = vmatpush1.bf16.msra.mxu1 %v3415_v11 }
 0x5d3   :  { %1453 = vmatprep.subr.bf16.mxu0 %v3421_v12  ;;  %1494 = vmatprep.subr.bf16.mxu1 %v3427_v14 }
 0x5d6   :  { %1454 = vmatpush1.bf16.msra.mxu0 %v3433_v15  ;;  %1495 = vmatpush1.bf16.msra.mxu1 %v3439_v0  ;;  %v3457_v15 = vld [vmem:[%s3636_s1 + $0xe0] ss:$16 sps:$4 sm:$0xff]   ;;  %v3463_v0 = vld [vmem:[%s3636_s1 + $0xe8] ss:$16 sps:$4 sm:$0xff]  }
 0x5d7   :  { %1455 = vmatprep.subr.bf16.mxu0 %v3445_v2  ;;  %1496 = vmatprep.subr.bf16.mxu1 %v3451_v3  ;;  %v2011_v2 = vld [vmem:[%s3638_s0 + $0x14] sm:$0xf] }
 0x5da   :  { %1456 = vmatpush1.bf16.msra.mxu0 %v3457_v15  ;;  %1497 = vmatpush1.bf16.msra.mxu1 %v3463_v0 }
 0x5db   :  { %1547 = vmatprep.subr.bf16.mxu0 %v2996_v17  ;;  %1588 = vmatprep.subr.bf16.mxu1 %v3002_v18 }
 0x5dd   :  { %1474 = vmatmul.mubr.bf16.vlgmr.msra.gmra.mrb[20].mxu0 %v2011_v2  ;;  %1515 = vmatmul.mubr.bf16.vlgmr.msra.gmra.mrb[20].mxu1 %v2011_v2 }
 0x5de   :  { %1548 = vmatpush1.bf16.msra.mxu0 %v3008_v27  ;;  %1589 = vmatpush1.bf16.msra.mxu1 %v3014_v22 }
 0x5df   :  { %1549 = vmatprep.subr.bf16.mxu0 %v3020_v24  ;;  %1590 = vmatprep.subr.bf16.mxu1 %v3026_v21 }
 0x5e0   :  { %1579 = vmatprep.mubr.bf16.mxu0 %v3730_v40  ;;  %1620 = vmatprep.mubr.bf16.mxu1 %v3730_v40 }
 0x5e2   :  { %1550 = vmatpush1.bf16.msra.mxu0 %v3034_v33  ;;  %1591 = vmatpush1.bf16.msra.mxu1 %v3040_v25 }
 0x5e3   :  { %1551 = vmatprep.subr.bf16.mxu0 %v3124_v1  ;;  %1592 = vmatprep.subr.bf16.mxu1 %v3130_v38 }
 0x5e6   :  { %1552 = vmatpush1.bf16.msra.mxu0 %v3136_v39  ;;  %1593 = vmatpush1.bf16.msra.mxu1 %v3142_v41 }
 0x5e7   :  { %1553 = vmatprep.subr.bf16.mxu0 %v3148_v42  ;;  %1594 = vmatprep.subr.bf16.mxu1 %v3154_v43 }
 0x5ea   :  { %1554 = vmatpush1.bf16.msra.mxu0 %v3160_v44  ;;  %1595 = vmatpush1.bf16.msra.mxu1 %v3166_v45 }
 0x5eb   :  { %1555 = vmatprep.subr.bf16.mxu0 %v3172_v46  ;;  %1596 = vmatprep.subr.bf16.mxu1 %v3178_v47 }
 0x5ee   :  { %1556 = vmatpush1.bf16.msra.mxu0 %v3184_v48  ;;  %1597 = vmatpush1.bf16.msra.mxu1 %v3190_v49 }
 0x5ef   :  { %1557 = vmatprep.subr.bf16.mxu0 %v3196_v50  ;;  %1598 = vmatprep.subr.bf16.mxu1 %v3202_v51 }
 0x5f2   :  { %1558 = vmatpush1.bf16.msra.mxu0 %v3208_v52  ;;  %1599 = vmatpush1.bf16.msra.mxu1 %v3214_v53 }
 0x5f3   :  { %1559 = vmatprep.subr.bf16.mxu0 %v3220_v54  ;;  %1600 = vmatprep.subr.bf16.mxu1 %v3226_v55 }
 0x5f6   :  { %1560 = vmatpush1.bf16.msra.mxu0 %v3232_v56  ;;  %1601 = vmatpush1.bf16.msra.mxu1 %v3238_v57 }
 0x5f7   :  { %1561 = vmatprep.subr.bf16.mxu0 %v3244_v58  ;;  %1602 = vmatprep.subr.bf16.mxu1 %v3250_v59 }
 0x5fa   :  { %1562 = vmatpush1.bf16.msra.mxu0 %v3256_v60  ;;  %1603 = vmatpush1.bf16.msra.mxu1 %v3262_v61 }
 0x5fb   :  { %1629 = vmatprep.subr.bf16.mxu0 %v3268_v62  ;;  %1670 = vmatprep.subr.bf16.mxu1 %v3274_v29 }
 0x6b0   :  { %v1475_v2 = vpop.f32.mrb[20].mxu0  ;;  %v1516_v54 = vpop.f32.mrb[20].mxu1 }
 0x6b1   :  { %2228 = vtanh.f32 %v1475_v2  ;;  %v1477_v55 = vpop.f32.mrb[21].mxu0  ;;  %v1518_v53 = vpop.f32.mrb[21].mxu1 }
 0x6b2   :  { %v1479_v56 = vpop.f32.mrb[22].mxu0  ;;  %v1520_v52 = vpop.f32.mrb[22].mxu1  ;;  %2230 = vtanh.f32 %v1477_v55 }
 0x6b3   :  { %v1480_v57 = vpop.f32.mrb[23].mxu0  ;;  %v1521_v58 = vpop.f32.mrb[23].mxu1  ;;  %2232 = vtanh.f32 %v1516_v54 }
 0x6b4   :  { %2234 = vtanh.f32 %v1518_v53  ;;  %v2013_v53 = vld [vmem:[%s3638_s0 + $0x18] sm:$0xf] }
 0x6bb   :  { %v2229_v59 = vpop.eup %2228 }
 0x6bc   :  { %v1524_v51 = vmul.f32 0.5, %v2229_v59  ;;  %v2231_v60 = vpop.eup %2230 }
 0x6bd   :  { %v1527_v61 = vmul.f32 0.5, %v2231_v60  ;;  %v2233_v62 = vpop.eup %2232 }
 0x6be   :  { %v1525_v50 = vadd.f32 0.5, %v1524_v51  ;;  %v2235_v52 = vpop.eup %2234 }
 0x6bf   :  { %v1528_v49 = vadd.f32 0.5, %v1527_v61  ;;  %v1531_v55 = vmul.f32 0.5, %v2235_v52 }
 0x6c0   :  { %v1534_v29 = vmul.f32 %v2233_v62, %v1525_v50  ;;  %v3800_v50 = vld [vmem:[#allocation20_spill] sm:$0xff] }
 0x6c1   :  { %v1533_v48 = vmul.f32 %v1528_v49, %v3278_v10  ;;  %v1532_v56 = vadd.f32 0.5, %v1531_v55  ;;  %v3799_v49 = vld [vmem:[#allocation19_spill] sm:$0xff] }
 0x6c3   :  { %v3506_v2 = vadd.f32 %v1534_v29, %v1533_v48  ;;  %v3798_v48 = vld [vmem:[#allocation18_spill] sm:$0xff] }
 0x6c5   :  { %2236 = vtanh.f32 %v3506_v2 }
 0x6cf   :  { %v2237_v57 = vpop.eup %2236 }
 0x6d0   :  { %v1537_v54 = vmul.f32 %v2237_v57, %v1532_v56 }
 0x6d2   :  { %v1538_v58 = vpack.c.bf16 %v1537_v54, %v1537_v54  ;;  %2012 = vst [vmem:[%s3640_s5 + $0x28] sm:$0xff] %v1537_v54 }
 0x6d4   :  { %1539 = vst [vmem:[#allocation2] sm:$0xf] %v1538_v58 }
 0x6db   :  { %v1546_v51 = vld [vmem:[#allocation2] sm:$0xf] }
 0x6dc   :  { %1580 = vmatmul.mubr.bf16.vlgmr.msra.gmra.mrb[24].mxu0 %v1546_v51  ;;  %1621 = vmatmul.mubr.bf16.vlgmr.msra.gmra.mrb[24].mxu1 %v1546_v51 }
 0x6dd   :  { %1630 = vmatpush1.bf16.msra.mxu0 %v3287_v13  ;;  %1671 = vmatpush1.bf16.msra.mxu1 %v3293_v4 }
 0x6de   :  { %1631 = vmatprep.subr.bf16.mxu0 %v3299_v5  ;;  %1672 = vmatprep.subr.bf16.mxu1 %v3305_v37 }
 0x6df   :  { %1661 = vmatprep.mubr.bf16.mxu0 %v3730_v40  ;;  %1702 = vmatprep.mubr.bf16.mxu1 %v3730_v40 }
 0x6e1   :  { %1632 = vmatpush1.bf16.msra.mxu0 %v3313_v31  ;;  %1673 = vmatpush1.bf16.msra.mxu1 %v3319_v19 }
 0x6e2   :  { %1633 = vmatprep.subr.bf16.mxu0 %v3325_v20  ;;  %1674 = vmatprep.subr.bf16.mxu1 %v3331_v26 }
 0x6e5   :  { %1634 = vmatpush1.bf16.msra.mxu0 %v3337_v6  ;;  %1675 = vmatpush1.bf16.msra.mxu1 %v3343_v7 }
 0x6e6   :  { %1635 = vmatprep.subr.bf16.mxu0 %v3349_v8  ;;  %1676 = vmatprep.subr.bf16.mxu1 %v3355_v30 }
 0x6e9   :  { %1636 = vmatpush1.bf16.msra.mxu0 %v3361_v32  ;;  %1677 = vmatpush1.bf16.msra.mxu1 %v3367_v23 }
 0x6ea   :  { %1637 = vmatprep.subr.bf16.mxu0 %v3373_v35  ;;  %1678 = vmatprep.subr.bf16.mxu1 %v3379_v36 }
 0x6ed   :  { %1638 = vmatpush1.bf16.msra.mxu0 %v3385_v28  ;;  %1679 = vmatpush1.bf16.msra.mxu1 %v3391_v16 }
 0x6ee   :  { %1639 = vmatprep.subr.bf16.mxu0 %v3397_v34  ;;  %1680 = vmatprep.subr.bf16.mxu1 %v3403_v63 }
 0x6f1   :  { %1640 = vmatpush1.bf16.msra.mxu0 %v3409_v9  ;;  %1681 = vmatpush1.bf16.msra.mxu1 %v3415_v11 }
 0x6f2   :  { %1641 = vmatprep.subr.bf16.mxu0 %v3421_v12  ;;  %1682 = vmatprep.subr.bf16.mxu1 %v3427_v14 }
 0x6f5   :  { %1642 = vmatpush1.bf16.msra.mxu0 %v3798_v48  ;;  %1683 = vmatpush1.bf16.msra.mxu1 %v3799_v49 }
 0x6f6   :  { %1643 = vmatprep.subr.bf16.mxu0 %v3800_v50  ;;  %1684 = vmatprep.subr.bf16.mxu1 %v3451_v3 }
 0x6f9   :  { %1644 = vmatpush1.bf16.msra.mxu0 %v3457_v15  ;;  %1685 = vmatpush1.bf16.msra.mxu1 %v3463_v0 }
 0x6fa   :  { %1735 = vmatprep.subr.bf16.mxu0 %v2996_v17  ;;  %1776 = vmatprep.subr.bf16.mxu1 %v3002_v18  ;;  %v3801_v17 = vld [vmem:[#allocation23_spill] sm:$0xff]  ;;  %v3802_v18 = vld [vmem:[#allocation24_spill] sm:$0xff] }
 0x6fc   :  { %1662 = vmatmul.mubr.bf16.vlgmr.msra.gmra.mrb[24].mxu0 %v2013_v53  ;;  %1703 = vmatmul.mubr.bf16.vlgmr.msra.gmra.mrb[24].mxu1 %v2013_v53 }
 0x6fd   :  { %1736 = vmatpush1.bf16.msra.mxu0 %v3008_v27  ;;  %1777 = vmatpush1.bf16.msra.mxu1 %v3014_v22  ;;  %v3803_v27 = vld [vmem:[#allocation4_spill] sm:$0xff]  ;;  %v3804_v22 = vld [vmem:[#allocation5_spill] sm:$0xff] }
 0x6fe   :  { %1737 = vmatprep.subr.bf16.mxu0 %v3020_v24  ;;  %1778 = vmatprep.subr.bf16.mxu1 %v3026_v21  ;;  %v3805_v24 = vld [vmem:[#allocation6_spill] sm:$0xff]  ;;  %v3806_v21 = vld [vmem:[#allocation7_spill] sm:$0xff] }
 0x6ff   :  { %1767 = vmatprep.mubr.bf16.mxu0 %v3730_v40  ;;  %1808 = vmatprep.mubr.bf16.mxu1 %v3730_v40 }
 0x701   :  { %1738 = vmatpush1.bf16.msra.mxu0 %v3034_v33  ;;  %1779 = vmatpush1.bf16.msra.mxu1 %v3040_v25  ;;  %v3807_v33 = vld [vmem:[#allocation8_spill] sm:$0xff]  ;;  %v3808_v25 = vld [vmem:[#allocation9_spill] sm:$0xff] }
 0x702   :  { %1739 = vmatprep.subr.bf16.mxu0 %v3124_v1  ;;  %1780 = vmatprep.subr.bf16.mxu1 %v3130_v38  ;;  %v3809_v1 = vld [vmem:[#allocation10_spill] sm:$0xff]  ;;  %v3810_v38 = vld [vmem:[#allocation11_spill] sm:$0xff] }
 0x705   :  { %1740 = vmatpush1.bf16.msra.mxu0 %v3136_v39  ;;  %1781 = vmatpush1.bf16.msra.mxu1 %v3142_v41  ;;  %v3811_v39 = vld [vmem:[#allocation12_spill] sm:$0xff]  ;;  %v3812_v41 = vld [vmem:[#allocation13_spill] sm:$0xff] }
 0x706   :  { %1741 = vmatprep.subr.bf16.mxu0 %v3148_v42  ;;  %1782 = vmatprep.subr.bf16.mxu1 %v3154_v43  ;;  %v3813_v42 = vld [vmem:[#allocation14_spill] sm:$0xff]  ;;  %v3814_v43 = vld [vmem:[#allocation15_spill] sm:$0xff] }
 0x709   :  { %1742 = vmatpush1.bf16.msra.mxu0 %v3160_v44  ;;  %1783 = vmatpush1.bf16.msra.mxu1 %v3166_v45  ;;  %v3815_v44 = vld [vmem:[#allocation16_spill] sm:$0xff]  ;;  %v3816_v45 = vld [vmem:[#allocation17_spill] sm:$0xff] }
 0x70a   :  { %1743 = vmatprep.subr.bf16.mxu0 %v3172_v46  ;;  %1784 = vmatprep.subr.bf16.mxu1 %v3178_v47 }
 0x70d   :  { %1744 = vmatpush1.bf16.msra.mxu0 %v3801_v17  ;;  %1785 = vmatpush1.bf16.msra.mxu1 %v3802_v18 }
 0x70e   :  { %1745 = vmatprep.subr.bf16.mxu0 %v3803_v27  ;;  %1786 = vmatprep.subr.bf16.mxu1 %v3804_v22 }
 0x711   :  { %1746 = vmatpush1.bf16.msra.mxu0 %v3805_v24  ;;  %1787 = vmatpush1.bf16.msra.mxu1 %v3806_v21 }
 0x712   :  { %1747 = vmatprep.subr.bf16.mxu0 %v3807_v33  ;;  %1788 = vmatprep.subr.bf16.mxu1 %v3808_v25 }
 0x715   :  { %1748 = vmatpush1.bf16.msra.mxu0 %v3809_v1  ;;  %1789 = vmatpush1.bf16.msra.mxu1 %v3810_v38 }
 0x716   :  { %1749 = vmatprep.subr.bf16.mxu0 %v3811_v39  ;;  %1790 = vmatprep.subr.bf16.mxu1 %v3812_v41 }
 0x719   :  { %1750 = vmatpush1.bf16.msra.mxu0 %v3813_v42  ;;  %1791 = vmatpush1.bf16.msra.mxu1 %v3814_v43 }
 0x71a   :  { %1817 = vmatprep.subr.bf16.mxu0 %v3815_v44  ;;  %1858 = vmatprep.subr.bf16.mxu1 %v3816_v45 }
 0x7cf   :  { %v1663_v46 = vpop.f32.mrb[24].mxu0  ;;  %v1704_v47 = vpop.f32.mrb[24].mxu1 }
 0x7d0   :  { %2238 = vtanh.f32 %v1663_v46  ;;  %v1665_v59 = vpop.f32.mrb[25].mxu0  ;;  %v1706_v60 = vpop.f32.mrb[25].mxu1 }
 0x7d1   :  { %v1667_v61 = vpop.f32.mrb[26].mxu0  ;;  %v1708_v62 = vpop.f32.mrb[26].mxu1  ;;  %2240 = vtanh.f32 %v1665_v59 }
 0x7d2   :  { %v1668_v29 = vpop.f32.mrb[27].mxu0  ;;  %v1709_v10 = vpop.f32.mrb[27].mxu1  ;;  %2242 = vtanh.f32 %v1704_v47 }
 0x7d3   :  { %2244 = vtanh.f32 %v1706_v60 }
 0x7da   :  { %v2239_v52 = vpop.eup %2238 }
 0x7db   :  { %v1712_v55 = vmul.f32 0.5, %v2239_v52  ;;  %v2241_v56 = vpop.eup %2240 }
 0x7dc   :  { %v1715_v54 = vmul.f32 0.5, %v2241_v56  ;;  %v2243_v58 = vpop.eup %2242 }
 0x7dd   :  { %v1713_v57 = vadd.f32 0.5, %v1712_v55  ;;  %v2245_v27 = vpop.eup %2244 }
 0x7de   :  { %v1716_v51 = vadd.f32 0.5, %v1715_v54  ;;  %v1719_v22 = vmul.f32 0.5, %v2245_v27 }
 0x7df   :  { %v1722_v53 = vmul.f32 %v2243_v58, %v1713_v57 }
 0x7e0   :  { %v1721_v17 = vmul.f32 %v1716_v51, %v3506_v2  ;;  %v1720_v24 = vadd.f32 0.5, %v1719_v22 }
 0x7e2   :  { %v3584_v18 = vadd.f32 %v1722_v53, %v1721_v17 }
 0x7e4   :  { %2246 = vtanh.f32 %v3584_v18 }
 0x7ee   :  { %v2247_v21 = vpop.eup %2246 }
 0x7ef   :  { %v1725_v33 = vmul.f32 %v2247_v21, %v1720_v24 }
 0x7f1   :  { %v1726_v25 = vpack.c.bf16 %v1725_v33, %v1725_v33  ;;  %2014 = vst [vmem:[%s3640_s5 + $0x30] sm:$0xff] %v1725_v33 }
 0x7f3   :  { %1727 = vst [vmem:[#allocation2] sm:$0xf] %v1726_v25 }
 0x7fa   :  { %v1734_v1 = vld [vmem:[#allocation2] sm:$0xf] }
 0x7fb   :  { %1768 = vmatmul.mubr.bf16.vlgmr.msra.gmra.mrb[28].mxu0 %v1734_v1  ;;  %1809 = vmatmul.mubr.bf16.vlgmr.msra.gmra.mrb[28].mxu1 %v1734_v1 }
 0x7fc   :  { %1818 = vmatpush1.bf16.msra.mxu0 %v3287_v13  ;;  %1859 = vmatpush1.bf16.msra.mxu1 %v3293_v4 }
 0x7fd   :  { %1819 = vmatprep.subr.bf16.mxu0 %v3299_v5  ;;  %1860 = vmatprep.subr.bf16.mxu1 %v3305_v37 }
 0x7fe   :  { %1849 = vmatprep.mubr.bf16.mxu0 %v3730_v40  ;;  %1890 = vmatprep.mubr.bf16.mxu1 %v3730_v40  ;;  %v2015_v40 = vld [vmem:[%s3638_s0 + $0x1c] sm:$0xf] }
 0x800   :  { %1820 = vmatpush1.bf16.msra.mxu0 %v3313_v31  ;;  %1861 = vmatpush1.bf16.msra.mxu1 %v3319_v19 }
 0x801   :  { %1821 = vmatprep.subr.bf16.mxu0 %v3325_v20  ;;  %1862 = vmatprep.subr.bf16.mxu1 %v3331_v26 }
 0x804   :  { %1822 = vmatpush1.bf16.msra.mxu0 %v3337_v6  ;;  %1863 = vmatpush1.bf16.msra.mxu1 %v3343_v7 }
 0x805   :  { %1823 = vmatprep.subr.bf16.mxu0 %v3349_v8  ;;  %1864 = vmatprep.subr.bf16.mxu1 %v3355_v30 }
 0x808   :  { %1824 = vmatpush1.bf16.msra.mxu0 %v3361_v32  ;;  %1865 = vmatpush1.bf16.msra.mxu1 %v3367_v23 }
 0x809   :  { %1825 = vmatprep.subr.bf16.mxu0 %v3373_v35  ;;  %1866 = vmatprep.subr.bf16.mxu1 %v3379_v36 }
 0x80c   :  { %1826 = vmatpush1.bf16.msra.mxu0 %v3385_v28  ;;  %1867 = vmatpush1.bf16.msra.mxu1 %v3391_v16 }
 0x80d   :  { %1827 = vmatprep.subr.bf16.mxu0 %v3397_v34  ;;  %1868 = vmatprep.subr.bf16.mxu1 %v3403_v63 }
 0x810   :  { %1828 = vmatpush1.bf16.msra.mxu0 %v3409_v9  ;;  %1869 = vmatpush1.bf16.msra.mxu1 %v3415_v11 }
 0x811   :  { %1829 = vmatprep.subr.bf16.mxu0 %v3421_v12  ;;  %1870 = vmatprep.subr.bf16.mxu1 %v3427_v14 }
 0x814   :  { %1830 = vmatpush1.bf16.msra.mxu0 %v3798_v48  ;;  %1871 = vmatpush1.bf16.msra.mxu1 %v3799_v49 }
 0x815   :  { %1831 = vmatprep.subr.bf16.mxu0 %v3800_v50  ;;  %1872 = vmatprep.subr.bf16.mxu1 %v3451_v3 }
 0x818   :  { %1832 = vmatpush1.bf16.msra.mxu0 %v3457_v15  ;;  %1873 = vmatpush1.bf16.msra.mxu1 %v3463_v0 }
 0x81b   :  { %1850 = vmatmul.mubr.bf16.vlgmr.msra.gmra.mrb[28].mxu0 %v2015_v40  ;;  %1891 = vmatmul.mubr.bf16.vlgmr.msra.gmra.mrb[28].mxu1 %v2015_v40 }
 0x8ee   :  { %v1851_v13 = vpop.f32.mrb[28].mxu0  ;;  %v1892_v4 = vpop.f32.mrb[28].mxu1 }
 0x8ef   :  { %2248 = vtanh.f32 %v1851_v13  ;;  %v1853_v5 = vpop.f32.mrb[29].mxu0  ;;  %v1894_v37 = vpop.f32.mrb[29].mxu1 }
 0x8f0   :  { %v1855_v31 = vpop.f32.mrb[30].mxu0  ;;  %v1896_v19 = vpop.f32.mrb[30].mxu1  ;;  %2250 = vtanh.f32 %v1853_v5 }
 0x8f1   :  { %v1856_v20 = vpop.f32.mrb[31].mxu0  ;;  %v1897_v26 = vpop.f32.mrb[31].mxu1  ;;  %2252 = vtanh.f32 %v1892_v4 }
 0x8f2   :  { %2254 = vtanh.f32 %v1894_v37 }
 0x8f9   :  { %v2249_v6 = vpop.eup %2248 }
 0x8fa   :  { %v1900_v7 = vmul.f32 0.5, %v2249_v6  ;;  %v2251_v8 = vpop.eup %2250 }
 0x8fb   :  { %v1903_v32 = vmul.f32 0.5, %v2251_v8  ;;  %v2253_v23 = vpop.eup %2252 }
 0x8fc   :  { %v1901_v30 = vadd.f32 0.5, %v1900_v7  ;;  %v2255_v34 = vpop.eup %2254 }
 0x8fd   :  { %v1904_v35 = vadd.f32 0.5, %v1903_v32  ;;  %v1907_v63 = vmul.f32 0.5, %v2255_v34 }
 0x8fe   :  { %v1910_v36 = vmul.f32 %v2253_v23, %v1901_v30 }
 0x8ff   :  { %v1909_v28 = vmul.f32 %v1904_v35, %v3584_v18  ;;  %v1908_v9 = vadd.f32 0.5, %v1907_v63 }
 0x901   :  { %v1911_v16 = vadd.f32 %v1910_v36, %v1909_v28 }
 0x903   :  { %2256 = vtanh.f32 %v1911_v16  ;;  %1926 = vst [vmem:[%s3641_s7] sm:$0xff] %v1911_v16 }
 0x90d   :  { %v2257_v11 = vpop.eup %2256 }
 0x90e   :  { %v1913_v12 = vmul.f32 %v2257_v11, %v1908_v9 }
 0x910   :  { %v1914_v14 = vpack.c.bf16 %v1913_v12, %v1913_v12  ;;  %2016 = vst [vmem:[%s3640_s5 + $0x38] sm:$0xff] %v1913_v12 }
 0x912   :  { %1915 = vst [vmem:[#allocation2] sm:$0xf] %v1914_v14 }
 0x919   :  { %v1922_v15 = vld [vmem:[#allocation2] sm:$0xf] }
 0x91a   :  { %v1923_v0 = vunpack.c.l.bf16 %v1922_v15 }
 0x91c   :  { %1924 = vst [vmem:[%s3642_s6] sm:$0xff] %v1923_v0 }

</bundles_post_ra>
